<compile_context>
chip_gen: v7x
topology: tpu7x:2x2x1
jax: 0.10.0
libtpu: 0.0.40
codegen_flags: <defaults>
</compile_context>

<pallas_src>
import math
import functools

import jax
import jax.numpy as jnp
from jax.experimental import pallas as pl
from jax.experimental.pallas import tpu as pltpu


HIDDEN = 512  # fc7 output width, fixed by the module definition


# ----------------------------------------------------------------------------
# helpers
# ----------------------------------------------------------------------------
def _round_up(x, m):
    return (x + m - 1) // m * m


def _pick_tile(dim, align, cap):
    """Largest power-of-two tile <= cap that divides round_up(dim, align)."""
    d = _round_up(dim, align)
    t = cap
    while t > align and d % t != 0:
        t //= 2
    if d % t != 0:
        t = align
    return t, d


@functools.lru_cache(maxsize=None)
def _vmem_limit_bytes():
    """Generation-aware scoped-VMEM request (leaves headroom on v7x)."""
    try:
        cap = int(pltpu.get_tpu_info().vmem_capacity_bytes)
    except Exception:   # conservative fallback (safe on v5e/v6e/v7x)
        cap = 64 * 1024 * 1024
    return max(32 * 1024 * 1024,
               min(cap - 16 * 1024 * 1024, 100 * 1024 * 1024))


# ----------------------------------------------------------------------------
# Kernel 1: fused  g = relu(x @ w_base + b_base) @ [w7_top | w7_bot]
#   - f32 VMEM accumulator for f, bias fused at k==0, ReLU + fc7 projection
#     fused at k==last, bf16 MXU inputs (x cast in-kernel), bf16 g output.
# ----------------------------------------------------------------------------
def _base_fc7_kernel(x_ref, wb_ref, bb_ref, w7_ref, o_ref, facc_ref):
    k = pl.program_id(1)

    @pl.when(k == 0)
    def _():
        facc_ref[...] = jnp.broadcast_to(bb_ref[...], facc_ref.shape)

    facc_ref[...] += jnp.dot(x_ref[...].astype(jnp.bfloat16), wb_ref[...],
                             preferred_element_type=jnp.float32)

    @pl.when(k == pl.num_programs(1) - 1)
    def _():
        f = jnp.maximum(facc_ref[...], 0.0).astype(jnp.bfloat16)   # [tm, Fp]
        o_ref[...] = jnp.dot(f, w7_ref[...],
                             preferred_element_type=jnp.float32
                             ).astype(o_ref.dtype)                 # [tm, 2H]


def pallas_base_fc7(x, prep, *, tm_cap=512, tk_cap=1024):
    """x: [M, frame_dim] f32 -> g: [M, 2*HIDDEN] bf16."""
    M, K = x.shape
    Kp, Fp = prep["Kp"], prep["Fp"]
    two_h = 2 * HIDDEN

    tm, Mp = _pick_tile(M, 16, tm_cap)        # 16-aligned for bf16 output tile
    if Mp // tm == 1 and tm >= 32:            # give both v7x TCs work if possible
        tm //= 2
    tk, Kp2 = _pick_tile(K, 128, tk_cap)
    assert Kp2 == Kp, (Kp2, Kp)

    if Mp != M or Kp != K:                    # f32 pad only when needed
        x = jnp.pad(x, ((0, Mp - M), (0, Kp - K)))

    grid_spec = pltpu.PrefetchScalarGridSpec(
        num_scalar_prefetch=0,
        grid=(Mp // tm, Kp // tk),
        in_specs=[
            pl.BlockSpec((tm, tk), lambda i, k: (i, k)),      # x
            pl.BlockSpec((tk, Fp), lambda i, k: (k, 0)),      # w_base (bf16)
            pl.BlockSpec((1, Fp), lambda i, k: (0, 0)),       # b_base
            pl.BlockSpec((Fp, two_h), lambda i, k: (0, 0)),   # w7_both (bf16)
        ],
        out_specs=pl.BlockSpec((tm, two_h), lambda i, k: (i, 0)),
        scratch_shapes=[pltpu.VMEM((tm, Fp), jnp.float32)],
    )
    out = pl.pallas_call(
        _base_fc7_kernel,
        out_shape=jax.ShapeDtypeStruct((Mp, two_h), jnp.bfloat16),
        grid_spec=grid_spec,
        compiler_params=pltpu.CompilerParams(
            dimension_semantics=("parallel", "arbitrary"),
            vmem_limit_bytes=_vmem_limit_bytes()),
    )(x, prep["w_base"], prep["b_base"], prep["w7_both"])
    return out[:M]


# ----------------------------------------------------------------------------
# Kernel 2: per-batch-tile pair formation + fc7 epilogue + fc8.
#   out[b, :] = b8 + sum_p relu(g[i_p, b, :H] + g[j_p, b, H:] + b7) @ w8[p]
# g slab (T, tb, 2H) and full w8 (P, H, Cp) are resident; pairs statically
# unrolled (pair indices are compile-time constants, no scalar prefetch).
# ----------------------------------------------------------------------------
def _pair_fc8_kernel(g_ref, b7_ref, w8_ref, b8_ref, o_ref, *, pairs, hidden):
    tb, cp = o_ref.shape
    acc = jnp.broadcast_to(b8_ref[...], (tb, cp))          # f32
    b7 = b7_ref[...]                                       # [1, H] f32
    # TODO(synk): on v7x, group 2-4 pairs per dot (K=1024-2048) to fill the
    # 256-wide MXU; per-pair dots are kept here for simplicity/robustness.
    for p, (i, j) in enumerate(pairs):
        gi = g_ref[i, :, :hidden].astype(jnp.float32)      # [tb, H]
        gj = g_ref[j, :, hidden:].astype(jnp.float32)      # [tb, H]
        pf = jnp.maximum(gi + gj + b7, 0.0).astype(jnp.bfloat16)
        acc = acc + jnp.dot(pf, w8_ref[p],
                            preferred_element_type=jnp.float32)
    o_ref[...] = acc


def pallas_pair_fc8(g3, prep, tb):
    """g3: [T, Bp, 2*HIDDEN] bf16 -> logits [Bp, Cp] f32."""
    T, Bp, two_h = g3.shape
    assert two_h == 2 * HIDDEN
    Cp, P = prep["Cp"], prep["pair_num"]
    pairs = tuple((i, j) for i in range(T) for j in range(i + 1, T))
    assert len(pairs) == P

    grid_spec = pltpu.PrefetchScalarGridSpec(
        num_scalar_prefetch=0,
        grid=(Bp // tb,),
        in_specs=[
            pl.BlockSpec((T, tb, two_h), lambda bi: (0, bi, 0)),   # g slab
            pl.BlockSpec((1, HIDDEN), lambda bi: (0, 0)),          # b7
            pl.BlockSpec((P, HIDDEN, Cp), lambda bi: (0, 0, 0)),   # w8 (bf16)
            pl.BlockSpec((1, Cp), lambda bi: (0, 0)),              # b8
        ],
        out_specs=pl.BlockSpec((tb, Cp), lambda bi: (bi, 0)),
    )
    out = pl.pallas_call(
        functools.partial(_pair_fc8_kernel, pairs=pairs, hidden=HIDDEN),
        out_shape=jax.ShapeDtypeStruct((Bp, Cp), jnp.float32),
        grid_spec=grid_spec,
        compiler_params=pltpu.CompilerParams(
            dimension_semantics=("parallel",),
            vmem_limit_bytes=_vmem_limit_bytes()),
    )(g3, prep["b7"], prep["w8"], prep["b8"])
    return out


# ----------------------------------------------------------------------------
# Parameter init (deterministic, mimics nn.Linear default U(-1/sqrt(in), +))
# ----------------------------------------------------------------------------
def _linear_init(key, fan_in, fan_out):
    kw, kb = jax.random.split(key)
    bound = 1.0 / math.sqrt(fan_in)
    w = jax.random.uniform(kw, (fan_in, fan_out), jnp.float32, -bound, bound)
    b = jax.random.uniform(kb, (fan_out,), jnp.float32, -bound, bound)
    return w, b


def init_opn_params(key, frame_dim, feature_size, tuple_len):
    class_num = math.factorial(tuple_len)
    pair_num = tuple_len * (tuple_len - 1) // 2
    k_base, k7, k8 = jax.random.split(key, 3)
    w_base, b_base = _linear_init(k_base, frame_dim, feature_size)   # base_network
    w7, b7 = _linear_init(k7, feature_size * 2, HIDDEN)              # fc7
    w8, b8 = _linear_init(k8, HIDDEN * pair_num, class_num)          # fc8
    return dict(w_base=w_base, b_base=b_base, w7=w7, b7=b7, w8=w8, b8=b8)


def prepare_kernel_params(params, frame_dim, feature_size, tuple_len):
    """One-time weight prep (bf16 cast / pad / reshape) hoisted out of forward."""
    F = feature_size
    P = tuple_len * (tuple_len - 1) // 2
    class_num = math.factorial(tuple_len)
    Kp = _round_up(frame_dim, 128)
    Fp = _round_up(F, 128)
    Cp = _round_up(class_num, 128)

    w_base = jnp.pad(params["w_base"].astype(jnp.bfloat16),
                     ((0, Kp - frame_dim), (0, Fp - F)))
    b_base = jnp.pad(params["b_base"].astype(jnp.float32),
                     (0, Fp - F)).reshape(1, Fp)
    w7 = params["w7"]                                           # [2F, 512]
    w7_both = jnp.concatenate([w7[:F, :], w7[F:, :]], axis=1)   # [F, 1024]
    w7_both = jnp.pad(w7_both.astype(jnp.bfloat16), ((0, Fp - F), (0, 0)))
    b7 = params["b7"].astype(jnp.float32).reshape(1, HIDDEN)
    w8 = params["w8"].reshape(P, HIDDEN, class_num)             # pair-major rows
    w8 = jnp.pad(w8.astype(jnp.bfloat16), ((0, 0), (0, 0), (0, Cp - class_num)))
    b8 = jnp.pad(params["b8"].astype(jnp.float32),
                 (0, Cp - class_num)).reshape(1, Cp)
    return dict(w_base=w_base, b_base=b_base, w7_both=w7_both, b7=b7,
                w8=w8, b8=b8,
                frame_dim=frame_dim, feature_size=F, tuple_len=tuple_len,
                pair_num=P, class_num=class_num, Kp=Kp, Fp=Fp, Cp=Cp)


# ----------------------------------------------------------------------------
# OPN forward
# ----------------------------------------------------------------------------
def opn_forward(prep, frames):
    B, T, C, H, W = frames.shape
    assert T == prep["tuple_len"]
    assert C * H * W == prep["frame_dim"]
    two_h = 2 * HIDDEN

    # base_network + fc7 projection over every frame (single fused kernel).
    x = frames.reshape(B * T, C * H * W)
    g = pallas_base_fc7(x, prep)                       # [B*T, 1024] bf16

    # Tiny bf16 XLA glue: [B,T,2H] -> [T,Bp,2H] so the pair kernel can index
    # frames on the leading axis and tile the batch axis.
    tb, Bp = _pick_tile(B, 16, 128)
    if Bp // tb == 1 and tb >= 32:                     # keep both v7x TCs busy
        tb //= 2
    g3 = g.reshape(B, T, two_h).transpose(1, 0, 2)
    if Bp != B:
        g3 = jnp.pad(g3, ((0, 0), (0, Bp - B), (0, 0)))

    # Dropout(p=0.5): eval-mode identity.
    # TODO(synk): training-mode stochastic dropout (pltpu.prng_*) not implemented.

    out = pallas_pair_fc8(g3, prep, tb)                # [Bp, Cp] f32
    return out[:B, :prep["class_num"]]


# ----------------------------------------------------------------------------
# Pure-JAX reference (f32), mirrors the PyTorch forward exactly.
# ----------------------------------------------------------------------------
def opn_reference(params, frames, tuple_len, feature_size):
    B, T, C, H, W = frames.shape
    x = frames.reshape(B * T, C * H * W)
    f = jax.nn.relu(x @ params["w_base"] + params["b_base"])
    f = f.reshape(B, T, feature_size)
    pf = []
    for i in range(T):
        for j in range(i + 1, T):
            cat = jnp.concatenate([f[:, i], f[:, j]], axis=1)
            pf.append(jax.nn.relu(cat @ params["w7"] + params["b7"]))
    h = jnp.concatenate(pf, axis=1)
    return h @ params["w8"] + params["b8"]


# ----------------------------------------------------------------------------
if __name__ == "__main__":
    B, T, C, H, W = 2, 3, 3, 16, 16          # tuple_len = 3 -> class_num = 6
    feature_size = 32
    frame_dim = C * H * W

    key = jax.random.PRNGKey(0)
    k_param, k_in = jax.random.split(key)
    params = init_opn_params(k_param, frame_dim, feature_size, T)
    prep = prepare_kernel_params(params, frame_dim, feature_size, T)
    frames = jax.random.normal(k_in, (B, T, C, H, W), jnp.float32)

    fwd = jax.jit(lambda fr: opn_forward(prep, fr))
    logits = jax.block_until_ready(fwd(frames))
    assert logits.shape == (B, math.factorial(T)), logits.shape

    ref = opn_reference(params, frames, tuple_len=T, feature_size=feature_size)
    max_err = float(jnp.max(jnp.abs(logits - ref)))
    assert max_err < 0.1, f"max abs error {max_err}"   # bf16 MXU, f32 accumulate

    print("KERNEL_OK")
</pallas_src>

<mosaic_0001>
module attributes {stable_mosaic.version = 11 : i64} {
  func.func @_base_fc7_kernel(%arg0: i32, %arg1: i32, %arg2: memref<16x256xf32, #tpu.memory_space<vmem>>, %arg3: memref<256x128xbf16, #tpu.memory_space<vmem>>, %arg4: memref<1x128xf32, #tpu.memory_space<vmem>>, %arg5: memref<128x1024xbf16, #tpu.memory_space<vmem>>, %arg6: memref<16x1024xbf16, #tpu.memory_space<vmem>>, %arg7: memref<16x128xf32, #tpu.memory_space<vmem>>) attributes {dimension_semantics = [#tpu.dimension_semantics<parallel>, #tpu.dimension_semantics<arbitrary>], iteration_bounds = array<i64: 1, 3>, scalar_prefetch = 0 : i64, scratch_operands = 1 : i64, tpu.core_type = #tpu.core_type<tc>, window_params = [{transform_indices = @transform_0, window_bounds = array<i64: 16, 256>}, {transform_indices = @transform_1, window_bounds = array<i64: 256, 128>}, {pipeline_mode = #tpu.pipeline_mode<synchronous>, transform_indices = @transform_2, window_bounds = array<i64: 1, 128>}, {pipeline_mode = #tpu.pipeline_mode<synchronous>, transform_indices = @transform_3, window_bounds = array<i64: 128, 1024>}, {transform_indices = @transform_4, window_bounds = array<i64: 16, 1024>}]} {
    %c0_i32 = arith.constant 0 : i32
    %0 = arith.cmpi eq, %arg1, %c0_i32 : i32
    %1 = arith.extui %0 : i1 to i32
    %c0_i32_0 = arith.constant 0 : i32
    %2 = arith.cmpi ne, %1, %c0_i32_0 : i32
    scf.if %2 {
      %c0_9 = arith.constant 0 : index
      %c0_10 = arith.constant 0 : index
      %13 = vector.load %arg4[%c0_9, %c0_10] : memref<1x128xf32, #tpu.memory_space<vmem>>, vector<1x128xf32>
      %14 = vector.shape_cast %13 : vector<1x128xf32> to vector<1x128xf32>
      %15 = vector.broadcast %14 : vector<1x128xf32> to vector<16x128xf32>
      %c0_11 = arith.constant 0 : index
      %c0_12 = arith.constant 0 : index
      %16 = vector.load %arg7[%c0_11, %c0_12] : memref<16x128xf32, #tpu.memory_space<vmem>>, vector<16x128xf32>
      tpu.vector_store %arg7[%c0_11, %c0_12], %15 {strides = array<i32>} : memref<16x128xf32, #tpu.memory_space<vmem>>, vector<16x128xf32>,
    } else {
    }
    %c0 = arith.constant 0 : index
    %c0_1 = arith.constant 0 : index
    %3 = vector.load %arg7[%c0, %c0_1] : memref<16x128xf32, #tpu.memory_space<vmem>>, vector<16x128xf32>
    %c0_2 = arith.constant 0 : index
    %c0_3 = arith.constant 0 : index
    %4 = vector.load %arg2[%c0_2, %c0_3] : memref<16x256xf32, #tpu.memory_space<vmem>>, vector<16x256xf32>
    %5 = arith.truncf %4 : vector<16x256xf32> to vector<16x256xbf16>
    %c0_4 = arith.constant 0 : index
    %c0_5 = arith.constant 0 : index
    %6 = vector.load %arg3[%c0_4, %c0_5] : memref<256x128xbf16, #tpu.memory_space<vmem>>, vector<256x128xbf16>
    %cst = arith.constant dense<0.000000e+00> : vector<16x128xf32>
    %7 = tpu.matmul %5, %6, %cst {dimension_numbers = #tpu.dot_dimension_numbers<[1], [0], [0], [1], [0, 0, 1, 1], [], []>} : vector<16x256xbf16>, vector<256x128xbf16>, vector<16x128xf32> -> vector<16x128xf32>
    %8 = arith.addf %3, %7 : vector<16x128xf32>
    %c0_6 = arith.constant 0 : index
    %c0_7 = arith.constant 0 : index
    %9 = vector.load %arg7[%c0_6, %c0_7] : memref<16x128xf32, #tpu.memory_space<vmem>>, vector<16x128xf32>
    tpu.vector_store %arg7[%c0_6, %c0_7], %8 {strides = array<i32>} : memref<16x128xf32, #tpu.memory_space<vmem>>, vector<16x128xf32>,
    %c2_i32 = arith.constant 2 : i32
    %10 = arith.cmpi eq, %arg1, %c2_i32 : i32
    %11 = arith.extui %10 : i1 to i32
    %c0_i32_8 = arith.constant 0 : i32
    %12 = arith.cmpi ne, %11, %c0_i32_8 : i32
    scf.if %12 {
      %c0_9 = arith.constant 0 : index
      %c0_10 = arith.constant 0 : index
      %13 = vector.load %arg7[%c0_9, %c0_10] : memref<16x128xf32, #tpu.memory_space<vmem>>, vector<16x128xf32>
      %cst_11 = arith.constant 0.000000e+00 : f32
      %14 = vector.broadcast %cst_11 : f32 to vector<16x128xf32>
      %15 = arith.maximumf %13, %14 : vector<16x128xf32>
      %16 = arith.truncf %15 : vector<16x128xf32> to vector<16x128xbf16>
      %c0_12 = arith.constant 0 : index
      %c0_13 = arith.constant 0 : index
      %17 = vector.load %arg5[%c0_12, %c0_13] : memref<128x1024xbf16, #tpu.memory_space<vmem>>, vector<128x1024xbf16>
      %cst_14 = arith.constant dense<0.000000e+00> : vector<16x1024xf32>
      %18 = tpu.matmul %16, %17, %cst_14 {dimension_numbers = #tpu.dot_dimension_numbers<[1], [0], [0], [1], [0, 0, 1, 1], [], []>} : vector<16x128xbf16>, vector<128x1024xbf16>, vector<16x1024xf32> -> vector<16x1024xf32>
      %19 = arith.truncf %18 : vector<16x1024xf32> to vector<16x1024xbf16>
      %c0_15 = arith.constant 0 : index
      %c0_16 = arith.constant 0 : index
      %20 = vector.load %arg6[%c0_15, %c0_16] : memref<16x1024xbf16, #tpu.memory_space<vmem>>, vector<16x1024xbf16>
      tpu.vector_store %arg6[%c0_15, %c0_16], %19 {strides = array<i32>} : memref<16x1024xbf16, #tpu.memory_space<vmem>>, vector<16x1024xbf16>,
    } else {
    }
    return
  }
  func.func @transform_0(%arg0: i32, %arg1: i32) -> (i32, i32) {
    %c0_i32 = arith.constant 0 : i32
    return %arg0, %arg1 : i32, i32
  }
  func.func @transform_1(%arg0: i32, %arg1: i32) -> (i32, i32) {
    %c0_i32 = arith.constant 0 : i32
    %c0_i32_0 = arith.constant 0 : i32
    return %arg1, %c0_i32 : i32, i32
  }
  func.func @transform_2(%arg0: i32, %arg1: i32) -> (i32, i32) {
    %c0_i32 = arith.constant 0 : i32
    %c0_i32_0 = arith.constant 0 : i32
    %c0_i32_1 = arith.constant 0 : i32
    return %c0_i32, %c0_i32_0 : i32, i32
  }
  func.func @transform_3(%arg0: i32, %arg1: i32) -> (i32, i32) {
    %c0_i32 = arith.constant 0 : i32
    %c0_i32_0 = arith.constant 0 : i32
    %c0_i32_1 = arith.constant 0 : i32
    return %c0_i32, %c0_i32_0 : i32, i32
  }
  func.func @transform_4(%arg0: i32, %arg1: i32) -> (i32, i32) {
    %c0_i32 = arith.constant 0 : i32
    %c0_i32_0 = arith.constant 0 : i32
    return %arg0, %c0_i32 : i32, i32
  }
}

module attributes {stable_mosaic.version = 11 : i64} {
  func.func @_pair_fc8_kernel(%arg0: i32, %arg1: memref<3x16x1024xbf16, #tpu.memory_space<vmem>>, %arg2: memref<1x512xf32, #tpu.memory_space<vmem>>, %arg3: memref<3x512x128xbf16, #tpu.memory_space<vmem>>, %arg4: memref<1x128xf32, #tpu.memory_space<vmem>>, %arg5: memref<16x128xf32, #tpu.memory_space<vmem>>) attributes {dimension_semantics = [#tpu.dimension_semantics<parallel>], iteration_bounds = array<i64: 1>, scalar_prefetch = 0 : i64, scratch_operands = 0 : i64, tpu.core_type = #tpu.core_type<tc>, window_params = [{transform_indices = @transform_0, window_bounds = array<i64: 3, 16, 1024>}, {pipeline_mode = #tpu.pipeline_mode<synchronous>, transform_indices = @transform_1, window_bounds = array<i64: 1, 512>}, {pipeline_mode = #tpu.pipeline_mode<synchronous>, transform_indices = @transform_2, window_bounds = array<i64: 3, 512, 128>}, {pipeline_mode = #tpu.pipeline_mode<synchronous>, transform_indices = @transform_3, window_bounds = array<i64: 1, 128>}, {transform_indices = @transform_4, window_bounds = array<i64: 16, 128>}]} {
    %c0 = arith.constant 0 : index
    %c0_0 = arith.constant 0 : index
    %0 = vector.load %arg4[%c0, %c0_0] : memref<1x128xf32, #tpu.memory_space<vmem>>, vector<1x128xf32>
    %1 = vector.shape_cast %0 : vector<1x128xf32> to vector<1x128xf32>
    %2 = vector.broadcast %1 : vector<1x128xf32> to vector<16x128xf32>
    %c0_1 = arith.constant 0 : index
    %c0_2 = arith.constant 0 : index
    %3 = vector.load %arg2[%c0_1, %c0_2] : memref<1x512xf32, #tpu.memory_space<vmem>>, vector<1x512xf32>
    %c0_3 = arith.constant 0 : index
    %c0_4 = arith.constant 0 : index
    %c0_5 = arith.constant 0 : index
    %4 = vector.load %arg1[%c0_3, %c0_4, %c0_5] : memref<3x16x1024xbf16, #tpu.memory_space<vmem>>, vector<1x16x512xbf16>
    %5 = vector.shape_cast %4 : vector<1x16x512xbf16> to vector<16x512xbf16>
    %6 = arith.extf %5 : vector<16x512xbf16> to vector<16x512xf32>
    %c1 = arith.constant 1 : index
    %c0_6 = arith.constant 0 : index
    %c512 = arith.constant 512 : index
    %7 = vector.load %arg1[%c1, %c0_6, %c512] : memref<3x16x1024xbf16, #tpu.memory_space<vmem>>, vector<1x16x512xbf16>
    %8 = vector.shape_cast %7 : vector<1x16x512xbf16> to vector<16x512xbf16>
    %9 = arith.extf %8 : vector<16x512xbf16> to vector<16x512xf32>
    %10 = arith.addf %6, %9 : vector<16x512xf32>
    %11 = vector.broadcast %3 : vector<1x512xf32> to vector<16x512xf32>
    %12 = arith.addf %10, %11 : vector<16x512xf32>
    %cst = arith.constant 0.000000e+00 : f32
    %13 = vector.broadcast %cst : f32 to vector<16x512xf32>
    %14 = arith.maximumf %12, %13 : vector<16x512xf32>
    %15 = arith.truncf %14 : vector<16x512xf32> to vector<16x512xbf16>
    %c0_7 = arith.constant 0 : index
    %c0_8 = arith.constant 0 : index
    %c0_9 = arith.constant 0 : index
    %16 = vector.load %arg3[%c0_7, %c0_8, %c0_9] : memref<3x512x128xbf16, #tpu.memory_space<vmem>>, vector<1x512x128xbf16>
    %17 = vector.shape_cast %16 : vector<1x512x128xbf16> to vector<512x128xbf16>
    %cst_10 = arith.constant dense<0.000000e+00> : vector<16x128xf32>
    %18 = tpu.matmul %15, %17, %cst_10 {dimension_numbers = #tpu.dot_dimension_numbers<[1], [0], [0], [1], [0, 0, 1, 1], [], []>} : vector<16x512xbf16>, vector<512x128xbf16>, vector<16x128xf32> -> vector<16x128xf32>
    %19 = arith.addf %2, %18 : vector<16x128xf32>
    %c0_11 = arith.constant 0 : index
    %c0_12 = arith.constant 0 : index
    %c0_13 = arith.constant 0 : index
    %20 = vector.load %arg1[%c0_11, %c0_12, %c0_13] : memref<3x16x1024xbf16, #tpu.memory_space<vmem>>, vector<1x16x512xbf16>
    %21 = vector.shape_cast %20 : vector<1x16x512xbf16> to vector<16x512xbf16>
    %22 = arith.extf %21 : vector<16x512xbf16> to vector<16x512xf32>
    %c2 = arith.constant 2 : index
    %c0_14 = arith.constant 0 : index
    %c512_15 = arith.constant 512 : index
    %23 = vector.load %arg1[%c2, %c0_14, %c512_15] : memref<3x16x1024xbf16, #tpu.memory_space<vmem>>, vector<1x16x512xbf16>
    %24 = vector.shape_cast %23 : vector<1x16x512xbf16> to vector<16x512xbf16>
    %25 = arith.extf %24 : vector<16x512xbf16> to vector<16x512xf32>
    %26 = arith.addf %22, %25 : vector<16x512xf32>
    %27 = vector.broadcast %3 : vector<1x512xf32> to vector<16x512xf32>
    %28 = arith.addf %26, %27 : vector<16x512xf32>
    %cst_16 = arith.constant 0.000000e+00 : f32
    %29 = vector.broadcast %cst_16 : f32 to vector<16x512xf32>
    %30 = arith.maximumf %28, %29 : vector<16x512xf32>
    %31 = arith.truncf %30 : vector<16x512xf32> to vector<16x512xbf16>
    %c1_17 = arith.constant 1 : index
    %c0_18 = arith.constant 0 : index
    %c0_19 = arith.constant 0 : index
    %32 = vector.load %arg3[%c1_17, %c0_18, %c0_19] : memref<3x512x128xbf16, #tpu.memory_space<vmem>>, vector<1x512x128xbf16>
    %33 = vector.shape_cast %32 : vector<1x512x128xbf16> to vector<512x128xbf16>
    %cst_20 = arith.constant dense<0.000000e+00> : vector<16x128xf32>
    %34 = tpu.matmul %31, %33, %cst_20 {dimension_numbers = #tpu.dot_dimension_numbers<[1], [0], [0], [1], [0, 0, 1, 1], [], []>} : vector<16x512xbf16>, vector<512x128xbf16>, vector<16x128xf32> -> vector<16x128xf32>
    %35 = arith.addf %19, %34 : vector<16x128xf32>
    %c1_21 = arith.constant 1 : index
    %c0_22 = arith.constant 0 : index
    %c0_23 = arith.constant 0 : index
    %36 = vector.load %arg1[%c1_21, %c0_22, %c0_23] : memref<3x16x1024xbf16, #tpu.memory_space<vmem>>, vector<1x16x512xbf16>
    %37 = vector.shape_cast %36 : vector<1x16x512xbf16> to vector<16x512xbf16>
    %38 = arith.extf %37 : vector<16x512xbf16> to vector<16x512xf32>
    %c2_24 = arith.constant 2 : index
    %c0_25 = arith.constant 0 : index
    %c512_26 = arith.constant 512 : index
    %39 = vector.load %arg1[%c2_24, %c0_25, %c512_26] : memref<3x16x1024xbf16, #tpu.memory_space<vmem>>, vector<1x16x512xbf16>
    %40 = vector.shape_cast %39 : vector<1x16x512xbf16> to vector<16x512xbf16>
    %41 = arith.extf %40 : vector<16x512xbf16> to vector<16x512xf32>
    %42 = arith.addf %38, %41 : vector<16x512xf32>
    %43 = vector.broadcast %3 : vector<1x512xf32> to vector<16x512xf32>
    %44 = arith.addf %42, %43 : vector<16x512xf32>
    %cst_27 = arith.constant 0.000000e+00 : f32
    %45 = vector.broadcast %cst_27 : f32 to vector<16x512xf32>
    %46 = arith.maximumf %44, %45 : vector<16x512xf32>
    %47 = arith.truncf %46 : vector<16x512xf32> to vector<16x512xbf16>
    %c2_28 = arith.constant 2 : index
    %c0_29 = arith.constant 0 : index
    %c0_30 = arith.constant 0 : index
    %48 = vector.load %arg3[%c2_28, %c0_29, %c0_30] : memref<3x512x128xbf16, #tpu.memory_space<vmem>>, vector<1x512x128xbf16>
    %49 = vector.shape_cast %48 : vector<1x512x128xbf16> to vector<512x128xbf16>
    %cst_31 = arith.constant dense<0.000000e+00> : vector<16x128xf32>
    %50 = tpu.matmul %47, %49, %cst_31 {dimension_numbers = #tpu.dot_dimension_numbers<[1], [0], [0], [1], [0, 0, 1, 1], [], []>} : vector<16x512xbf16>, vector<512x128xbf16>, vector<16x128xf32> -> vector<16x128xf32>
    %51 = arith.addf %35, %50 : vector<16x128xf32>
    %c0_32 = arith.constant 0 : index
    %c0_33 = arith.constant 0 : index
    %52 = vector.load %arg5[%c0_32, %c0_33] : memref<16x128xf32, #tpu.memory_space<vmem>>, vector<16x128xf32>
    tpu.vector_store %arg5[%c0_32, %c0_33], %51 {strides = array<i32>} : memref<16x128xf32, #tpu.memory_space<vmem>>, vector<16x128xf32>,
    return
  }
  func.func @transform_0(%arg0: i32) -> (i32, i32, i32) {
    %c0_i32 = arith.constant 0 : i32
    %c0_i32_0 = arith.constant 0 : i32
    %c0_i32_1 = arith.constant 0 : i32
    return %c0_i32, %arg0, %c0_i32_0 : i32, i32, i32
  }
  func.func @transform_1(%arg0: i32) -> (i32, i32) {
    %c0_i32 = arith.constant 0 : i32
    %c0_i32_0 = arith.constant 0 : i32
    %c0_i32_1 = arith.constant 0 : i32
    return %c0_i32, %c0_i32_0 : i32, i32
  }
  func.func @transform_2(%arg0: i32) -> (i32, i32, i32) {
    %c0_i32 = arith.constant 0 : i32
    %c0_i32_0 = arith.constant 0 : i32
    %c0_i32_1 = arith.constant 0 : i32
    %c0_i32_2 = arith.constant 0 : i32
    return %c0_i32, %c0_i32_0, %c0_i32_1 : i32, i32, i32
  }
  func.func @transform_3(%arg0: i32) -> (i32, i32) {
    %c0_i32 = arith.constant 0 : i32
    %c0_i32_0 = arith.constant 0 : i32
    %c0_i32_1 = arith.constant 0 : i32
    return %c0_i32, %c0_i32_0 : i32, i32
  }
  func.func @transform_4(%arg0: i32) -> (i32, i32) {
    %c0_i32 = arith.constant 0 : i32
    %c0_i32_0 = arith.constant 0 : i32
    return %arg0, %c0_i32 : i32, i32
  }
}

</mosaic_0001>

<bundles_post_ra>
// kernel: _lambda_.2
= control target key start
LH: loop header
LB: loop body
LE: loop exit
PB: predicated region body
PF: predicated region fallthrough
CT: control target
= control target key end

     0   :  { %s1428_s15 = smov 0   ;;  %s1430_s16 = smov 0   ;;  %s1748_s0 = inlined_call_operand.vmem [shape: f32[16,768], index: 0, kind: input, shape index: {}]   ;;  %s1749_s1 = inlined_call_operand.vmem [shape: bf16[768,128], index: 1, kind: input, shape index: {}]   ;;  %s1750_s2 = inlined_call_operand.vmem [shape: f32[1,128], index: 2, kind: input, shape index: {}]   ;;  %s1751_s3 = inlined_call_operand.vmem [shape: bf16[128,1024], index: 3, kind: input, shape index: {}]   ;;  %s1752_s4 = inlined_call_operand.vmem [shape: bf16[16,1024], index: 4, kind: output, shape index: {}]  }
   0x1   :  { %s1432_s17 = smov 0   ;;  %s1434_s18 = smov 0  }
   0x2   :  { %s1436_s19 = smov 0  }
   0x3 LB: > { %s23_s20 = sadd.s32 1, %s1396_s18  ;;  %p42_p1 = scmp.ne.s32.totalorder %s1388_s16, %s1384_s15  ;;  %s1400_s19 = sphi %s1436_s19, %s14_s19   ;;  %s1396_s18 = sphi %s1434_s18, %s1756_s18   ;;  %s1392_s17 = sphi %s1432_s17, %s1755_s17   ;;  %s1388_s16 = sphi %s1430_s16, %s1754_s16   ;;  %s1384_s15 = sphi %s1428_s15, %s1753_s15  }
   0x4   : > { %p24_p0 = scmp.ge.s32.totalorder %s23_s20, 3  ;;  %p43_p2 = scmp.eq.s32.totalorder %s1400_s19, 0 }
   0x5   : > { %s35_s22 = sadd.s32 1, %s1388_s16  ;;  %p1171_p5 = scmp.ge.s32.totalorder %s1400_s19, 3 }
   0x6   : > { %s1758_s20 = smov (%p24_p0, %s23_s20), 0  ;;  %p44_p3 = por %p43_p2, %p42_p1 }
   0x7   : > { %s31_s21 = ssub.s32 %s1396_s18, %s1758_s20  ;;  %168 = sbr.rel (%p1171_p5) target bundleno = 21 (0x15), region = 24 }
   0x8   : > { %p33_p4 = scmp.eq.s32.totalorder %s31_s21, 0 }
   0xa   : > { %s1463_s23 = scalar_select %p33_p4, %s1388_s16, %s35_s22  }
   0xe   : > { %171 = sbr.rel (!%p44_p3) target bundleno = 21 (0x15), region = 28  ;;  %s173_s24 = sand.u32 (%p44_p3), 1, %s1388_s16  }
   0xf   : > { %s1274_s25 = sshll.u32 (%p44_p3), %s1396_s18, 4  ;;  %s1172_s26 = sshll.u32 (%p44_p3), %s173_s24, 5 }
  0x10   : > { %s181_s29 = scalar_lea.vmem (%p44_p3), %s1748_s0, %s1274_s25  ;;  %s175_s30 = scalar_lea.vmem (%p44_p3), [#allocation3], %s1172_s26 }
  0x11   : > { %v194_v0 = vld [vmem:[%s181_s29] sm:$0xff] (%p44_p3)  ;;  %v196_v1 = vld [vmem:[%s181_s29 + $0x8] sm:$0xff] (%p44_p3)  ;;  %v198_v2 = vld [vmem:[%s181_s29 + $0x30] sm:$0xff] (%p44_p3) }
  0x12   : > { %195 = vst [vmem:[%s175_s30] sm:$0xff] (%p44_p3), %v194_v0  ;;  %197 = vst [vmem:[%s175_s30 + $0x8] sm:$0xff] (%p44_p3), %v196_v1  ;;  %v200_v3 = vld [vmem:[%s181_s29 + $0x38] sm:$0xff] (%p44_p3) }
  0x13   : > { %199 = vst [vmem:[%s175_s30 + $0x10] sm:$0xff] (%p44_p3), %v198_v2  ;;  %201 = vst [vmem:[%s175_s30 + $0x18] sm:$0xff] (%p44_p3), %v200_v3 }
  0x15 PF: > { %p1175_p6 = scmp.ge.s32.totalorder %s1400_s19, 1  ;;  %p215_p7 = scmp.lt.s32.totalorder %s1400_s19, 4 }
  0x17   : > { %p216_p8 = pnand %p1175_p6, %p215_p7 }
  0x18   : > { %s222_s5 = sand.u32 (!%p216_p8), 1, %s1384_s15   ;;  %s1177_s6 = sshll.u32 (!%p216_p8), %s1392_s17, 5 }
  0x19   : > { %219 = sbr.rel (%p216_p8) target bundleno = 553 (0x229), region = 55  ;;  %s1176_s7 = sshll.u32 (!%p216_p8), %s222_s5, 5 }
  0x1a   : > { %p256_p9 = scmp.lt.s32.totalorder (!%p216_p8), %s1177_s6, 95  ;;  %s1480_s12 = scalar_lea.vmem (!%p216_p8), [#allocation3], %s1176_s7 }
  0x1b   : > { %p1179_p10 = scmp.ne.s32.totalorder (!%p216_p8), %s1392_s17, 0 }
  0x20   : > { %s1760_s6 = smov (!%p256_p9, %s1177_s6), 95  ;;  %272 = sbr.rel (%p1179_p10) target bundleno = 39 (0x27), region = 63 }
  0x21   : > { %s1178_s8 = sshll.u32 %s1760_s6, 2  ;;  %v1180_v4 = vld [vmem:[%s1750_s2] ss:$0 sm:$0xff] (!%p1179_p10) }
  0x22   : > { %s1478_s11 = scalar_lea.vmem %s1749_s1, %s1178_s8  ;;  %280 = vst [vmem:[#allocation2] sm:$0xff] (!%p1179_p10), %v1180_v4  ;;  %281 = vst [vmem:[#allocation2 + $0x8] sm:$0xff] (!%p1179_p10), %v1180_v4 }
  0x27 PF: > { %v1346_v5 = vld [vmem:[%s1478_s11 + $0x40] sm:$0xff]   ;;  %v1348_v7 = vld [vmem:[%s1478_s11 + $0x48] sm:$0xff]   ;;  %v1350_v9 = vld [vmem:[%s1478_s11 + $0x50] sm:$0xff]   ;;  %p1197_p11 = scmp.ne.s32.totalorder %s1392_s17, 2 }
  0x28   : > { %v1347_v6 = vld [vmem:[%s1478_s11] sm:$0xff]   ;;  %1283 = vmatprep.subr.bf16.mxu0 %v1346_v5  ;;  %v1349_v8 = vld [vmem:[%s1478_s11 + $0x8] sm:$0xff]   ;;  %v1351_v10 = vld [vmem:[%s1478_s11 + $0x10] sm:$0xff]   ;;  %v1402_v45 = vmov (!%p1197_p11), 0  }
  0x29   : > { %1284 = vmatpush3.bf16.msra.mxu0 %v1347_v6  ;;  %v1352_v11 = vld [vmem:[%s1478_s11 + $0x58] sm:$0xff]   ;;  %v1354_v13 = vld [vmem:[%s1478_s11 + $0x60] sm:$0xff]   ;;  %v1356_v15 = vld [vmem:[%s1478_s11 + $0x68] sm:$0xff]   ;;  %931 = vmatprep.mubr.bf16.mxu1 (!%p1197_p11), %v1402_v45 }
  0x2a   : > { %1285 = vmatprep.subr.bf16.mxu0 %v1348_v7  ;;  %v1353_v12 = vld [vmem:[%s1478_s11 + $0x18] sm:$0xff]   ;;  %v1355_v14 = vld [vmem:[%s1478_s11 + $0x20] sm:$0xff]   ;;  %v287_v17 = vld [vmem:[%s1480_s12 + $0x18] sm:$0xff] }
  0x2b   : > { %v285_v16 = vld [vmem:[%s1480_s12 + $0x8] sm:$0xff]  ;;  %v1357_v19 = vld [vmem:[%s1478_s11 + $0x28] sm:$0xff]   ;;  %v1358_v20 = vld [vmem:[%s1478_s11 + $0x70] sm:$0xff]  }
  0x2c   : > { %v289_v18 = vpack.c.bf16 %v287_v17, %v285_v16  ;;  %v1359_v21 = vld [vmem:[%s1478_s11 + $0x30] sm:$0xff]   ;;  %v1360_v22 = vld [vmem:[%s1478_s11 + $0x78] sm:$0xff]   ;;  %v286_v25 = vld [vmem:[%s1480_s12 + $0x10] sm:$0xff] }
  0x2d   : > { %1286 = vmatpush3.bf16.msra.mxu0 %v1349_v8  ;;  %v1361_v23 = vld [vmem:[%s1478_s11 + $0x38] sm:$0xff]   ;;  %v284_v24 = vld [vmem:[%s1480_s12] sm:$0xff]  ;;  %v282_v28 = vld [vmem:[#allocation2] sm:$0xff] }
  0x2e   : > { %1287 = vmatprep.subr.bf16.mxu0 %v1350_v9  ;;  %450 = vmatprep.mubr.bf16.mxu0 %v289_v18  ;;  %v288_v26 = vpack.c.bf16 %v286_v25, %v284_v24  ;;  %v283_v32 = vld [vmem:[#allocation2 + $0x8] sm:$0xff]  ;;  %v472_v37 = vld [vmem:[%s1751_s3] sm:$0xff] (!%p1197_p11) }
  0x2f   : > { %v476_v38 = vld [vmem:[%s1751_s3 + $0x20] sm:$0xff] (!%p1197_p11)  ;;  %v473_v39 = vld [vmem:[%s1751_s3 + $0x8] sm:$0xff] (!%p1197_p11) }
  0x30   : > { %v1199_v40 = vcombine.high (!%p1197_p11), %v472_v37, %v476_v38  ;;  %v477_v41 = vld [vmem:[%s1751_s3 + $0x28] sm:$0xff] (!%p1197_p11)  ;;  %v1198_v42 = vcombine.low (!%p1197_p11), %v472_v37, %v476_v38  ;;  %v480_v43 = vld [vmem:[%s1751_s3 + $0x40] sm:$0xff] (!%p1197_p11)  ;;  %v474_v38 = vld [vmem:[%s1751_s3 + $0x10] sm:$0xff] (!%p1197_p11) }
  0x31   : > { %1288 = vmatpush3.bf16.msra.mxu0 %v1351_v10  ;;  %v484_v44 = vld [vmem:[%s1751_s3 + $0x60] sm:$0xff] (!%p1197_p11)  ;;  %v1201_v46 = vcombine.high (!%p1197_p11), %v473_v39, %v477_v41  ;;  %v1200_v47 = vcombine.low (!%p1197_p11), %v473_v39, %v477_v41  ;;  %v481_v49 = vld [vmem:[%s1751_s3 + $0x48] sm:$0xff] (!%p1197_p11)  ;;  %v478_v39 = vld [vmem:[%s1751_s3 + $0x30] sm:$0xff] (!%p1197_p11) }
  0x32   : > { %1289 = vmatprep.subr.bf16.mxu0 %v1352_v11  ;;  %v1207_v48 = vcombine.high (!%p1197_p11), %v480_v43, %v484_v44  ;;  %v485_v50 = vld [vmem:[%s1751_s3 + $0x68] sm:$0xff] (!%p1197_p11)  ;;  %v488_v51 = vld [vmem:[%s1751_s3 + $0x80] sm:$0xff] (!%p1197_p11)  ;;  %v1206_v56 = vcombine.low (!%p1197_p11), %v480_v43, %v484_v44  ;;  %v479_v43 = vld [vmem:[%s1751_s3 + $0x38] sm:$0xff] (!%p1197_p11) }
  0x33   : > { %v1209_v52 = vcombine.high (!%p1197_p11), %v481_v49, %v485_v50  ;;  %v492_v53 = vld [vmem:[%s1751_s3 + $0xa0] sm:$0xff] (!%p1197_p11)  ;;  %v489_v54 = vld [vmem:[%s1751_s3 + $0x88] sm:$0xff] (!%p1197_p11)  ;;  %899 = vmatprep.subr.bf16.mxu1 (!%p1197_p11), %v1201_v46  ;;  %v1208_v57 = vcombine.low (!%p1197_p11), %v481_v49, %v485_v50  ;;  %v482_v49 = vld [vmem:[%s1751_s3 + $0x50] sm:$0xff] (!%p1197_p11) }
  0x34   : > { %v493_v55 = vld [vmem:[%s1751_s3 + $0xa8] sm:$0xff] (!%p1197_p11)  ;;  %900 = vmatpush1.bf16.msra.mxu1 (!%p1197_p11), %v1200_v47  ;;  %v1215_v58 = vcombine.high (!%p1197_p11), %v488_v51, %v492_v53  ;;  %v496_v60 = vld [vmem:[%s1751_s3 + $0xc0] sm:$0xff] (!%p1197_p11)  ;;  %v1214_v0 = vcombine.low (!%p1197_p11), %v488_v51, %v492_v53  ;;  %v1203_v47 = vcombine.high (!%p1197_p11), %v474_v38, %v478_v39  ;;  %v486_v50 = vld [vmem:[%s1751_s3 + $0x70] sm:$0xff] (!%p1197_p11) }
  0x35   : > { %1290 = vmatpush3.bf16.msra.mxu0 %v1353_v12  ;;  %901 = vmatprep.subr.bf16.mxu1 (!%p1197_p11), %v1209_v52  ;;  %v1217_v59 = vcombine.high (!%p1197_p11), %v489_v54, %v493_v55  ;;  %v500_v61 = vld [vmem:[%s1751_s3 + $0xe0] sm:$0xff] (!%p1197_p11)  ;;  %v497_v62 = vld [vmem:[%s1751_s3 + $0xc8] sm:$0xff] (!%p1197_p11)  ;;  %v1216_v1 = vcombine.low (!%p1197_p11), %v489_v54, %v493_v55  ;;  %v483_v52 = vld [vmem:[%s1751_s3 + $0x58] sm:$0xff] (!%p1197_p11)  ;;  %v1202_v54 = vcombine.low (!%p1197_p11), %v474_v38, %v478_v39 }
  0x36   : > { %1291 = vmatprep.subr.bf16.mxu0 %v1354_v13  ;;  %v501_v63 = vld [vmem:[%s1751_s3 + $0xe8] sm:$0xff] (!%p1197_p11)  ;;  %v1223_v2 = vcombine.high (!%p1197_p11), %v496_v60, %v500_v61  ;;  %v504_v4 = vld [vmem:[%s1751_s3 + $0x100] sm:$0xff] (!%p1197_p11)  ;;  %v1222_v8 = vcombine.low (!%p1197_p11), %v496_v60, %v500_v61  ;;  %v487_v53 = vld [vmem:[%s1751_s3 + $0x78] sm:$0xff] (!%p1197_p11) }
  0x37   : > { %v1225_v3 = vcombine.high (!%p1197_p11), %v497_v62, %v501_v63  ;;  %v508_v5 = vld [vmem:[%s1751_s3 + $0x120] sm:$0xff] (!%p1197_p11)  ;;  %v505_v6 = vld [vmem:[%s1751_s3 + $0x108] sm:$0xff] (!%p1197_p11)  ;;  %v1224_v9 = vcombine.low (!%p1197_p11), %v497_v62, %v501_v63  ;;  %v491_v60 = vld [vmem:[%s1751_s3 + $0x98] sm:$0xff] (!%p1197_p11)  ;;  %v1210_v62 = vcombine.low (!%p1197_p11), %v482_v49, %v486_v50  ;;  %v1212_v63 = vcombine.low (!%p1197_p11), %v483_v52, %v487_v53 }
  0x38   : > { %902 = vmatpush1.bf16.msra.mxu1 (!%p1197_p11), %v1208_v57  ;;  %v509_v7 = vld [vmem:[%s1751_s3 + $0x128] sm:$0xff] (!%p1197_p11)  ;;  %v1231_v10 = vcombine.high (!%p1197_p11), %v504_v4, %v508_v5  ;;  %v512_v12 = vld [vmem:[%s1751_s3 + $0x140] sm:$0xff] (!%p1197_p11)  ;;  %v1230_v16 = vcombine.low (!%p1197_p11), %v504_v4, %v508_v5  ;;  %v1213_v57 = vcombine.high (!%p1197_p11), %v483_v52, %v487_v53  ;;  %v495_v61 = vld [vmem:[%s1751_s3 + $0xb8] sm:$0xff] (!%p1197_p11) }
  0x39   : > { %1292 = vmatpush3.bf16.msra.mxu0 %v1355_v14  ;;  %903 = vmatprep.subr.bf16.mxu1 (!%p1197_p11), %v1217_v59  ;;  %v1233_v11 = vcombine.high (!%p1197_p11), %v505_v6, %v509_v7  ;;  %v516_v13 = vld [vmem:[%s1751_s3 + $0x160] sm:$0xff] (!%p1197_p11)  ;;  %v513_v14 = vld [vmem:[%s1751_s3 + $0x148] sm:$0xff] (!%p1197_p11)  ;;  %v1232_v17 = vcombine.low (!%p1197_p11), %v505_v6, %v509_v7  ;;  %v494_v59 = vld [vmem:[%s1751_s3 + $0xb0] sm:$0xff] (!%p1197_p11)  ;;  %v1220_v7 = vcombine.low (!%p1197_p11), %v491_v60, %v495_v61 }
  0x3a   : > { %1293 = vmatprep.subr.bf16.mxu0 %v1356_v15  ;;  %v517_v15 = vld [vmem:[%s1751_s3 + $0x168] sm:$0xff] (!%p1197_p11)  ;;  %v1239_v18 = vcombine.high (!%p1197_p11), %v512_v12, %v516_v13  ;;  %v1238_v24 = vcombine.low (!%p1197_p11), %v512_v12, %v516_v13  ;;  %v499_v4 = vld [vmem:[%s1751_s3 + $0xd8] sm:$0xff] (!%p1197_p11) }
  0x3b   : > { %v1240_v25 = vcombine.low (!%p1197_p11), %v513_v14, %v517_v15  ;;  %v503_v5 = vld [vmem:[%s1751_s3 + $0xf8] sm:$0xff] (!%p1197_p11) }
  0x3c   : > { %904 = vmatpush1.bf16.msra.mxu1 (!%p1197_p11), %v1216_v1  ;;  %v1221_v1 = vcombine.high (!%p1197_p11), %v491_v60, %v495_v61  ;;  %v511_v12 = vld [vmem:[%s1751_s3 + $0x138] sm:$0xff] (!%p1197_p11) }
  0x3d   : > { %1294 = vmatpush3.bf16.msra.mxu0 %v1357_v19  ;;  %905 = vmatprep.subr.bf16.mxu1 (!%p1197_p11), %v1225_v3  ;;  %v1241_v19 = vcombine.high (!%p1197_p11), %v513_v14, %v517_v15  ;;  %v502_v3 = vld [vmem:[%s1751_s3 + $0xf0] sm:$0xff] (!%p1197_p11)  ;;  %v1228_v14 = vcombine.low (!%p1197_p11), %v499_v4, %v503_v5 }
  0x3e   : > { %1295 = vmatprep.subr.bf16.mxu0 %v1358_v20  ;;  %v520_v20 = vld [vmem:[%s1751_s3 + $0x180] sm:$0xff] (!%p1197_p11) }
  0x40   : > { %906 = vmatpush1.bf16.msra.mxu1 (!%p1197_p11), %v1224_v9  ;;  %v1229_v9 = vcombine.high (!%p1197_p11), %v499_v4, %v503_v5 }
  0x41   : > { %1296 = vmatpush3.bf16.msra.mxu0 %v1359_v21  ;;  %907 = vmatprep.subr.bf16.mxu1 (!%p1197_p11), %v1233_v11  ;;  %v524_v21 = vld [vmem:[%s1751_s3 + $0x1a0] sm:$0xff] (!%p1197_p11)  ;;  %v510_v11 = vld [vmem:[%s1751_s3 + $0x130] sm:$0xff] (!%p1197_p11) }
  0x42   : > { %1297 = vmatprep.subr.bf16.mxu0 %v1360_v22  ;;  %v521_v22 = vld [vmem:[%s1751_s3 + $0x188] sm:$0xff] (!%p1197_p11) }
  0x44   : > { %908 = vmatpush1.bf16.msra.mxu1 (!%p1197_p11), %v1232_v17  ;;  %v514_v17 = vld [vmem:[%s1751_s3 + $0x150] sm:$0xff] (!%p1197_p11) }
  0x45   : > { %1298 = vmatpush3.bf16.msra.mxu0 %v1361_v23  ;;  %v525_v23 = vld [vmem:[%s1751_s3 + $0x1a8] sm:$0xff] (!%p1197_p11)  ;;  %909 = vmatprep.subr.bf16.mxu1 (!%p1197_p11), %v1241_v19  ;;  %v515_v19 = vld [vmem:[%s1751_s3 + $0x158] sm:$0xff] (!%p1197_p11) }
  0x46   : > { %856 = vmatprep.subr.bf16.mxu0 (!%p1197_p11), %v1199_v40 }
  0x48   : > { %451 = vmatmul.mubr.bf16.vlgmr.msra.gmra.mrb[0].mxu0 %v288_v26  ;;  %v1247_v26 = vcombine.high (!%p1197_p11), %v520_v20, %v524_v21  ;;  %910 = vmatpush1.bf16.msra.mxu1 (!%p1197_p11), %v1240_v25  ;;  %v522_v25 = vld [vmem:[%s1751_s3 + $0x190] sm:$0xff] (!%p1197_p11) }
  0x49   : > { %888 = vmatprep.mubr.bf16.mxu0 (!%p1197_p11), %v1402_v45  ;;  %857 = vmatpush1.bf16.msra.mxu0 (!%p1197_p11), %v1198_v42  ;;  %v475_v42 = vld [vmem:[%s1751_s3 + $0x18] sm:$0xff] (!%p1197_p11) }
  0x4a   : > { %858 = vmatprep.subr.bf16.mxu0 (!%p1197_p11), %v1207_v48  ;;  %v1205_v48 = vcombine.high (!%p1197_p11), %v475_v42, %v479_v43  ;;  %v1204_v55 = vcombine.low (!%p1197_p11), %v475_v42, %v479_v43 }
  0x4d   : > { %859 = vmatpush1.bf16.msra.mxu0 (!%p1197_p11), %v1206_v56  ;;  %v1211_v56 = vcombine.high (!%p1197_p11), %v482_v49, %v486_v50 }
  0x4e   : > { %860 = vmatprep.subr.bf16.mxu0 (!%p1197_p11), %v1215_v58  ;;  %v490_v58 = vld [vmem:[%s1751_s3 + $0x90] sm:$0xff] (!%p1197_p11) }
  0x4f   : > { %v1218_v6 = vcombine.low (!%p1197_p11), %v490_v58, %v494_v59 }
  0x51   : > { %861 = vmatpush1.bf16.msra.mxu0 (!%p1197_p11), %v1214_v0  ;;  %v1219_v0 = vcombine.high (!%p1197_p11), %v490_v58, %v494_v59 }
  0x52   : > { %862 = vmatprep.subr.bf16.mxu0 (!%p1197_p11), %v1223_v2  ;;  %v498_v2 = vld [vmem:[%s1751_s3 + $0xd0] sm:$0xff] (!%p1197_p11) }
  0x53   : > { %v1226_v13 = vcombine.low (!%p1197_p11), %v498_v2, %v502_v3 }
  0x55   : > { %863 = vmatpush1.bf16.msra.mxu0 (!%p1197_p11), %v1222_v8  ;;  %v1227_v8 = vcombine.high (!%p1197_p11), %v498_v2, %v502_v3 }
  0x56   : > { %864 = vmatprep.subr.bf16.mxu0 (!%p1197_p11), %v1231_v10  ;;  %v506_v10 = vld [vmem:[%s1751_s3 + $0x110] sm:$0xff] (!%p1197_p11) }
  0x57   : > { %v1235_v15 = vcombine.high (!%p1197_p11), %v506_v10, %v510_v11 }
  0x59   : > { %865 = vmatpush1.bf16.msra.mxu0 (!%p1197_p11), %v1230_v16 }
  0x5a   : > { %866 = vmatprep.subr.bf16.mxu0 (!%p1197_p11), %v1239_v18  ;;  %v518_v18 = vld [vmem:[%s1751_s3 + $0x170] sm:$0xff] (!%p1197_p11) }
  0x5d   : > { %867 = vmatpush1.bf16.msra.mxu0 (!%p1197_p11), %v1238_v24 }
  0x5e   : > { %868 = vmatprep.subr.bf16.mxu0 (!%p1197_p11), %v1247_v26  ;;  %v526_v26 = vld [vmem:[%s1751_s3 + $0x1b0] sm:$0xff] (!%p1197_p11) }
 0x11b   : > { %v1299_v27 = vpop.f32.mrb[0].mxu0 }
 0x11c   : > { %v1300_v29 = vpop.f32.mrb[1].mxu0 }
 0x11d   : > { %v1301_v30 = vadd.f32 %v1300_v29, %v1299_v27  ;;  %v1302_v31 = vpop.f32.mrb[2].mxu0  ;;  %466 = sbr.rel (%p1197_p11) target bundleno = 553 (0x229), region = 67  ;;  %v1249_v27 = vcombine.high (!%p1197_p11), %v521_v22, %v525_v23  ;;  %v532_v29 = vld [vmem:[%s1751_s3 + $0x1e0] sm:$0xff] (!%p1197_p11) }
 0x11e   : > { %v1303_v33 = vpop.f32.mrb[3].mxu0 }
 0x11f   : > { %v459_v34 = vadd.f32 %v1301_v30, %v282_v28  ;;  %v1304_v35 = vadd.f32 %v1303_v33, %v1302_v31  ;;  %v528_v28 = vld [vmem:[%s1751_s3 + $0x1c0] sm:$0xff] (!%p1197_p11)  ;;  %v529_v30 = vld [vmem:[%s1751_s3 + $0x1c8] sm:$0xff] (!%p1197_p11)  ;;  %911 = vmatprep.subr.bf16.mxu1 (!%p1197_p11), %v1249_v27  ;;  %v523_v27 = vld [vmem:[%s1751_s3 + $0x198] sm:$0xff] (!%p1197_p11) }
 0x120   : > { %v533_v31 = vld [vmem:[%s1751_s3 + $0x1e8] sm:$0xff] (!%p1197_p11)  ;;  %v1254_v44 = vcombine.low (!%p1197_p11), %v528_v28, %v532_v29 }
 0x121   : > { %461 = vst [vmem:[#allocation2] sm:$0xff] %v459_v34  ;;  %v460_v36 = vadd.f32 %v1304_v35, %v283_v32  ;;  %v1246_v32 = vcombine.low (!%p1197_p11), %v520_v20, %v524_v21  ;;  %v1248_v35 = vcombine.low (!%p1197_p11), %v521_v22, %v525_v23  ;;  %v1257_v37 = vcombine.high (!%p1197_p11), %v529_v30, %v533_v31  ;;  %v519_v20 = vld [vmem:[%s1751_s3 + $0x178] sm:$0xff] (!%p1197_p11) }
 0x122   : > { %v1256_v46 = vcombine.low (!%p1197_p11), %v529_v30, %v533_v31  ;;  %v1234_v21 = vcombine.low (!%p1197_p11), %v506_v10, %v510_v11  ;;  %v1243_v23 = vcombine.high (!%p1197_p11), %v514_v17, %v518_v18  ;;  %v1245_v24 = vcombine.high (!%p1197_p11), %v515_v19, %v519_v20 }
 0x123   : > { %462 = vst [vmem:[#allocation2 + $0x8] sm:$0xff] %v460_v36  ;;  %v1255_v36 = vcombine.high (!%p1197_p11), %v528_v28, %v532_v29  ;;  %869 = vmatpush1.bf16.msra.mxu0 (!%p1197_p11), %v1246_v32  ;;  %912 = vmatpush1.bf16.msra.mxu1 (!%p1197_p11), %v1248_v35  ;;  %v527_v28 = vld [vmem:[%s1751_s3 + $0x1b8] sm:$0xff] (!%p1197_p11)  ;;  %v1242_v29 = vcombine.low (!%p1197_p11), %v514_v17, %v518_v18 }
 0x124   : > { %913 = vmatprep.subr.bf16.mxu1 %v1257_v37  ;;  %v1244_v30 = vcombine.low %v515_v19, %v519_v20  ;;  %v1251_v31 = vcombine.high %v522_v25, %v526_v26  ;;  %v1253_v32 = vcombine.high %v523_v27, %v527_v28  ;;  %v531_v35 = vld [vmem:[%s1751_s3 + $0x1d8] sm:$0xff]  ;;  %v1250_v37 = vcombine.low %v522_v25, %v526_v26 }
 0x125   : > { %870 = vmatprep.subr.bf16.mxu0 %v1255_v36  ;;  %v535_v36 = vld [vmem:[%s1751_s3 + $0x1f8] sm:$0xff]  ;;  %v1252_v38 = vcombine.low %v523_v27, %v527_v28 }
 0x126   : > { %v1260_v42 = vcombine.low %v531_v35, %v535_v36 }
 0x127   : > { %871 = vmatpush1.bf16.msra.mxu0 %v1254_v44  ;;  %914 = vmatpush1.bf16.msra.mxu1 %v1256_v46 }
 0x128   : > { %v467_v33 = vld [vmem:[#allocation2] sm:$0xff]  ;;  %942 = vmatprep.subr.bf16.mxu0 %v1203_v47  ;;  %985 = vmatprep.subr.bf16.mxu1 %v1205_v48 }
 0x129   : > { %v469_v40 = vmax.f32 %v467_v33, 0.0  ;;  %v530_v33 = vld [vmem:[%s1751_s3 + $0x1d0] sm:$0xff] }
 0x12a   : > { %v468_v34 = vld [vmem:[#allocation2 + $0x8] sm:$0xff] }
 0x12b   : > { %v470_v41 = vmax.f32 %v468_v34, 0.0  ;;  %v534_v34 = vld [vmem:[%s1751_s3 + $0x1f0] sm:$0xff] }
 0x12c   : > { %v1259_v39 = vcombine.high %v530_v33, %v534_v34 }
 0x12d   : > { %v1623_v51 = vpack.c.bf16 %v470_v41, %v469_v40  ;;  %v1261_v40 = vcombine.high %v531_v35, %v535_v36  ;;  %v1258_v41 = vcombine.low %v530_v33, %v534_v34 }
 0x12f   : > { %889 = vmatmul.mubr.bf16.vlgmr.msra.gmra.mrb[0].mxu0 %v1623_v51  ;;  %932 = vmatmul.mubr.bf16.vlgmr.msra.gmra.mrb[0].mxu1 %v1623_v51 }
 0x130   : > { %943 = vmatpush1.bf16.msra.mxu0 %v1202_v54  ;;  %986 = vmatpush1.bf16.msra.mxu1 %v1204_v55 }
 0x131   : > { %944 = vmatprep.subr.bf16.mxu0 %v1211_v56  ;;  %987 = vmatprep.subr.bf16.mxu1 %v1213_v57 }
 0x132   : > { %974 = vmatprep.mubr.bf16.mxu0 %v1402_v45  ;;  %1017 = vmatprep.mubr.bf16.mxu1 %v1402_v45  ;;  %v507_v45 = vld [vmem:[%s1751_s3 + $0x118] sm:$0xff] }
 0x133   : > { %v1237_v16 = vcombine.high %v507_v45, %v511_v12  ;;  %v1236_v22 = vcombine.low %v507_v45, %v511_v12 }
 0x134   : > { %945 = vmatpush1.bf16.msra.mxu0 %v1210_v62  ;;  %988 = vmatpush1.bf16.msra.mxu1 %v1212_v63 }
 0x135   : > { %946 = vmatprep.subr.bf16.mxu0 %v1219_v0  ;;  %989 = vmatprep.subr.bf16.mxu1 %v1221_v1 }
 0x138   : > { %947 = vmatpush1.bf16.msra.mxu0 %v1218_v6  ;;  %990 = vmatpush1.bf16.msra.mxu1 %v1220_v7 }
 0x139   : > { %948 = vmatprep.subr.bf16.mxu0 %v1227_v8  ;;  %991 = vmatprep.subr.bf16.mxu1 %v1229_v9 }
 0x13c   : > { %949 = vmatpush1.bf16.msra.mxu0 %v1226_v13  ;;  %992 = vmatpush1.bf16.msra.mxu1 %v1228_v14 }
 0x13d   : > { %950 = vmatprep.subr.bf16.mxu0 %v1235_v15  ;;  %993 = vmatprep.subr.bf16.mxu1 %v1237_v16 }
 0x140   : > { %951 = vmatpush1.bf16.msra.mxu0 %v1234_v21  ;;  %994 = vmatpush1.bf16.msra.mxu1 %v1236_v22 }
 0x141   : > { %952 = vmatprep.subr.bf16.mxu0 %v1243_v23  ;;  %995 = vmatprep.subr.bf16.mxu1 %v1245_v24 }
 0x144   : > { %953 = vmatpush1.bf16.msra.mxu0 %v1242_v29  ;;  %996 = vmatpush1.bf16.msra.mxu1 %v1244_v30 }
 0x145   : > { %954 = vmatprep.subr.bf16.mxu0 %v1251_v31  ;;  %997 = vmatprep.subr.bf16.mxu1 %v1253_v32 }
 0x148   : > { %955 = vmatpush1.bf16.msra.mxu0 %v1250_v37  ;;  %998 = vmatpush1.bf16.msra.mxu1 %v1252_v38 }
 0x149   : > { %956 = vmatprep.subr.bf16.mxu0 %v1259_v39  ;;  %999 = vmatprep.subr.bf16.mxu1 %v1261_v40 }
 0x14c   : > { %957 = vmatpush1.bf16.msra.mxu0 %v1258_v41  ;;  %1000 = vmatpush1.bf16.msra.mxu1 %v1260_v42 }
 0x14f   : > { %975 = vmatmul.mubr.bf16.vlgmr.msra.gmra.mrb[4].mxu0 %v1623_v51  ;;  %1018 = vmatmul.mubr.bf16.vlgmr.msra.gmra.mrb[4].mxu1 %v1623_v51 }
 0x202   : > { %v890_v43 = vpop.f32.mrb[0].mxu0  ;;  %v933_v44 = vpop.f32.mrb[0].mxu1 }
 0x203   : > { %v892_v46 = vpop.f32.mrb[1].mxu0  ;;  %v935_v48 = vpop.f32.mrb[1].mxu1 }
 0x204   : > { %v1275_v47 = vpack.c.bf16 %v892_v46, %v890_v43  ;;  %v894_v49 = vpop.f32.mrb[2].mxu0  ;;  %v1276_v50 = vpack.c.bf16 %v935_v48, %v933_v44  ;;  %v937_v52 = vpop.f32.mrb[2].mxu1 }
 0x205   : > { %v896_v53 = vpop.f32.mrb[3].mxu0  ;;  %v939_v55 = vpop.f32.mrb[3].mxu1 }
 0x206   : > { %1076 = vst [vmem:[%s1752_s4] sm:$0xff] %v1275_v47  ;;  %v1279_v54 = vpack.c.bf16 %v896_v53, %v894_v49  ;;  %1077 = vst [vmem:[%s1752_s4 + $0x8] sm:$0xff] %v1276_v50  ;;  %v1280_v51 = vpack.c.bf16 %v939_v55, %v937_v52 }
 0x208   : > { %1080 = vst [vmem:[%s1752_s4 + $0x20] sm:$0xff] %v1279_v54  ;;  %1081 = vst [vmem:[%s1752_s4 + $0x28] sm:$0xff] %v1280_v51 }
 0x222   : > { %v976_v56 = vpop.f32.mrb[4].mxu0  ;;  %v1019_v57 = vpop.f32.mrb[4].mxu1 }
 0x223   : > { %v978_v58 = vpop.f32.mrb[5].mxu0  ;;  %v1021_v60 = vpop.f32.mrb[5].mxu1 }
 0x224   : > { %v1277_v59 = vpack.c.bf16 %v978_v58, %v976_v56  ;;  %v980_v61 = vpop.f32.mrb[6].mxu0  ;;  %v1278_v62 = vpack.c.bf16 %v1021_v60, %v1019_v57  ;;  %v1023_v63 = vpop.f32.mrb[6].mxu1 }
 0x225   : > { %v982_v0 = vpop.f32.mrb[7].mxu0  ;;  %v1025_v2 = vpop.f32.mrb[7].mxu1 }
 0x226   : > { %1078 = vst [vmem:[%s1752_s4 + $0x10] sm:$0xff] %v1277_v59  ;;  %v1281_v1 = vpack.c.bf16 %v982_v0, %v980_v61  ;;  %1079 = vst [vmem:[%s1752_s4 + $0x18] sm:$0xff] %v1278_v62  ;;  %v1282_v3 = vpack.c.bf16 %v1025_v2, %v1023_v63 }
 0x228   : > { %1082 = vst [vmem:[%s1752_s4 + $0x30] sm:$0xff] %v1281_v1  ;;  %1083 = vst [vmem:[%s1752_s4 + $0x38] sm:$0xff] %v1282_v3 }
 0x229 PF: > { %s14_s19 = sadd.s32 1, %s1400_s19   ;;  %s1753_s15 = smov %s1388_s16 }
 0x22a   : > { %p11_p12 = scmp.ge.s32.totalorder %s14_s19, 5   ;;  %s1754_s16 = smov %s1463_s23 }
 0x22b   : > { %s1755_s17 = smov %s1396_s18  ;;  %s1756_s18 = smov %s1758_s20 }
 0x22c   :  { %13 = sbr.rel (!%p11_p12) target bundleno = 3 (0x3), region = 105 }

// kernel: _lambda_.3
= control target key start
LH: loop header
LB: loop body
LE: loop exit
PB: predicated region body
PF: predicated region fallthrough
CT: control target
= control target key end

     0   :  { %v60_v24 = vlaneseq  ;;  %s2173_s2 = inlined_call_operand.vmem [shape: bf16[3,512,128], index: 2, kind: input, shape index: {}]   ;;  %s2174_s0 = inlined_call_operand.vmem [shape: bf16[3,16,1024], index: 0, kind: input, shape index: {}]   ;;  %s2175_s1 = inlined_call_operand.vmem [shape: f32[1,512], index: 1, kind: input, shape index: {}]   ;;  %s2176_s3 = inlined_call_operand.vmem [shape: f32[1,128], index: 3, kind: input, shape index: {}]   ;;  %s2177_s4 = inlined_call_operand.vmem [shape: f32[16,128], index: 4, kind: output, shape index: {}]  }
   0x1   :  { %v1578_v0 = vld [vmem:[%s2173_s2 + $0x40] sm:$0xff]   ;;  %v1582_v4 = vld [vmem:[%s2173_s2 + $0x48] sm:$0xff]   ;;  %v1586_v8 = vld [vmem:[%s2173_s2 + $0x50] sm:$0xff]  }
   0x2   :  { %v1579_v1 = vld [vmem:[%s2173_s2 + $0xc0] sm:$0xff]   ;;  %1446 = vmatprep.subr.bf16.mxu0 %v1578_v0  ;;  %v1583_v5 = vld [vmem:[%s2173_s2 + $0xc8] sm:$0xff]   ;;  %v1587_v9 = vld [vmem:[%s2173_s2 + $0xd0] sm:$0xff]   ;;  %v1783_v29 = vshrl.u32 %v60_v24, 7 }
   0x3   :  { %v1580_v2 = vld [vmem:[%s2173_s2] sm:$0xff]   ;;  %1468 = vmatprep.subr.bf16.mxu1 %v1579_v1  ;;  %v1584_v6 = vld [vmem:[%s2173_s2 + $0x8] sm:$0xff]   ;;  %v1588_v10 = vld [vmem:[%s2173_s2 + $0x10] sm:$0xff]  }
   0x4   :  { %v1581_v3 = vld [vmem:[%s2173_s2 + $0x80] sm:$0xff]   ;;  %1447 = vmatpush3.bf16.msra.mxu0 %v1580_v2  ;;  %v1585_v7 = vld [vmem:[%s2173_s2 + $0x88] sm:$0xff]   ;;  %v1589_v11 = vld [vmem:[%s2173_s2 + $0x90] sm:$0xff]   ;;  %v66_v34 = vsub.s32 1, %v1783_v29  ;;  %v74_v46 = vsub.s32 3, %v1783_v29  ;;  %v62_v50 = vsub.s32 0, %v1783_v29 }
   0x5   :  { %1469 = vmatpush3.bf16.msra.mxu1 %v1581_v3  ;;  %1448 = vmatprep.subr.bf16.mxu0 %v1582_v4  ;;  %v1590_v12 = vld [vmem:[%s2173_s2 + $0x58] sm:$0xff]   ;;  %v1594_v16 = vld [vmem:[%s2173_s2 + $0x60] sm:$0xff]   ;;  %v1598_v20 = vld [vmem:[%s2173_s2 + $0x68] sm:$0xff]   ;;  %v70_v51 = vsub.s32 2, %v1783_v29 }
   0x6   :  { %1470 = vmatprep.subr.bf16.mxu1 %v1583_v5  ;;  %v1591_v13 = vld [vmem:[%s2173_s2 + $0xd8] sm:$0xff]   ;;  %v1595_v17 = vld [vmem:[%s2173_s2 + $0xe0] sm:$0xff]   ;;  %v1599_v21 = vld [vmem:[%s2173_s2 + $0xe8] sm:$0xff]  }
   0x7   :  { %v1592_v14 = vld [vmem:[%s2173_s2 + $0x18] sm:$0xff]   ;;  %v1596_v18 = vld [vmem:[%s2173_s2 + $0x20] sm:$0xff]   ;;  %v1600_v22 = vld [vmem:[%s2173_s2 + $0x28] sm:$0xff]  }
   0x8   :  { %1449 = vmatpush3.bf16.msra.mxu0 %v1584_v6  ;;  %v1593_v15 = vld [vmem:[%s2173_s2 + $0x98] sm:$0xff]   ;;  %v1597_v19 = vld [vmem:[%s2173_s2 + $0xa0] sm:$0xff]   ;;  %v1601_v23 = vld [vmem:[%s2173_s2 + $0xa8] sm:$0xff]  }
   0x9   :  { %1471 = vmatpush3.bf16.msra.mxu1 %v1585_v7  ;;  %1450 = vmatprep.subr.bf16.mxu0 %v1586_v8  ;;  %v1602_v25 = vld [vmem:[%s2173_s2 + $0x70] sm:$0xff]   ;;  %v1606_v30 = vld [vmem:[%s2173_s2 + $0x78] sm:$0xff]   ;;  %v25_v35 = vld [vmem:[%s2175_s1] sm:$0xf] }
   0xa   :  { %1472 = vmatprep.subr.bf16.mxu1 %v1587_v9  ;;  %v1603_v26 = vld [vmem:[%s2173_s2 + $0xf0] sm:$0xff]   ;;  %v1607_v31 = vld [vmem:[%s2173_s2 + $0xf8] sm:$0xff]   ;;  %v1804_v36 = vld [vmem:[%s2174_s0] sm:$0xff]  ;;  %v1831_v48 = vrot.slane %v25_v35, %v66_v34  ;;  %v1856_v6 = vrot.slane %v25_v35, %v74_v46 }
   0xb   :  { %v1604_v27 = vld [vmem:[%s2173_s2 + $0x30] sm:$0xff]   ;;  %v1608_v32 = vld [vmem:[%s2173_s2 + $0x38] sm:$0xff]   ;;  %v1809_v37 = vld [vmem:[%s2174_s0 + $0x20] sm:$0xff]  ;;  %v31_v38 = vunpack.c.h.bf16 %v1804_v36  ;;  %v30_v47 = vunpack.c.l.bf16 %v1804_v36 }
   0xc   :  { %1451 = vmatpush3.bf16.msra.mxu0 %v1588_v10  ;;  %v1605_v28 = vld [vmem:[%s2173_s2 + $0xb0] sm:$0xff]   ;;  %v1609_v33 = vld [vmem:[%s2173_s2 + $0xb8] sm:$0xff]   ;;  %v35_v39 = vunpack.c.h.bf16 %v1809_v37  ;;  %v1822_v44 = vld [vmem:[%s2174_s0 + $0x8] sm:$0xff]  ;;  %v34_v57 = vunpack.c.l.bf16 %v1809_v37 }
   0xd   :  { %1473 = vmatpush3.bf16.msra.mxu1 %v1589_v11  ;;  %1452 = vmatprep.subr.bf16.mxu0 %v1590_v12  ;;  %v1210_v40 = vld [vmem:[%s2174_s0 + $0x50] sm:$0xff]  ;;  %v1827_v45 = vld [vmem:[%s2174_s0 + $0x28] sm:$0xff]  ;;  %v1211_v49 = vld [vmem:[%s2174_s0 + $0x58] sm:$0xff]  ;;  %v33_v55 = vunpack.c.h.bf16 %v1822_v44  ;;  %v32_v59 = vunpack.c.l.bf16 %v1822_v44 }
   0xe   :  { %1474 = vmatprep.subr.bf16.mxu1 %v1591_v13  ;;  %v1212_v41 = vld [vmem:[%s2174_s0 + $0x70] sm:$0xff]  ;;  %v44_v42 = vunpack.c.h.bf16 %v1210_v40  ;;  %v43_v52 = vunpack.c.l.bf16 %v1210_v40  ;;  %v1213_v56 = vld [vmem:[%s2174_s0 + $0x78] sm:$0xff]  ;;  %v37_v60 = vunpack.c.h.bf16 %v1827_v45  ;;  %v1610_v61 = vld [vmem:[%s2173_s2 + $0x140] sm:$0xff]   ;;  %v45_v0 = vunpack.c.l.bf16 %v1211_v49 }
   0xf   :  { %v48_v43 = vunpack.c.h.bf16 %v1212_v41  ;;  %v47_v58 = vunpack.c.l.bf16 %v1212_v41  ;;  %v46_v1 = vunpack.c.h.bf16 %v1211_v49  ;;  %v1611_v2 = vld [vmem:[%s2173_s2 + $0x1c0] sm:$0xff]   ;;  %v36_v3 = vunpack.c.l.bf16 %v1827_v45  ;;  %v1861_v9 = vld [vmem:[%s2174_s0 + $0x90] sm:$0xff]  ;;  %v1614_v41 = vld [vmem:[%s2173_s2 + $0x148] sm:$0xff]  }
  0x10   :  { %1453 = vmatpush3.bf16.msra.mxu0 %v1592_v14  ;;  %v52_v53 = vadd.f32 %v44_v42, %v31_v38  ;;  %v49_v4 = vunpack.c.l.bf16 %v1213_v56  ;;  %v50_v5 = vunpack.c.h.bf16 %v1213_v56  ;;  %v1866_v10 = vld [vmem:[%s2174_s0 + $0xb0] sm:$0xff]  ;;  %v51_v12 = vadd.f32 %v43_v52, %v30_v47  ;;  %v1613_v40 = vld [vmem:[%s2173_s2 + $0x180] sm:$0xff]   ;;  %v1615_v52 = vld [vmem:[%s2173_s2 + $0x1c8] sm:$0xff]  }
  0x11   :  { %1475 = vmatpush3.bf16.msra.mxu1 %v1593_v15  ;;  %1454 = vmatprep.subr.bf16.mxu0 %v1594_v16  ;;  %v56_v54 = vadd.f32 %v48_v43, %v35_v39  ;;  %v54_v11 = vadd.f32 %v46_v1, %v33_v55  ;;  %v55_v14 = vadd.f32 %v47_v58, %v34_v57  ;;  %v1616_v58 = vld [vmem:[%s2173_s2 + $0x108] sm:$0xff]   ;;  %v1618_v1 = vld [vmem:[%s2173_s2 + $0x150] sm:$0xff]  }
  0x12   :  { %1476 = vmatprep.subr.bf16.mxu1 %v1595_v17  ;;  %v81_v62 = vadd.f32 %v1831_v48, %v52_v53  ;;  %v58_v13 = vadd.f32 %v50_v5, %v37_v60  ;;  %v1875_v17 = vrot.slane %v25_v35, %v62_v50  ;;  %v1635_v44 = vld [vmem:[%s2173_s2 + $0x1f0] sm:$0xff]  }
  0x13   :  { %v85_v63 = vadd.f32 %v1831_v48, %v56_v54  ;;  %v83_v16 = vadd.f32 %v1856_v6, %v54_v11  ;;  %v1636_v45 = vld [vmem:[%s2173_s2 + $0x130] sm:$0xff]  }
  0x14   :  { %1455 = vmatpush3.bf16.msra.mxu0 %v1596_v18  ;;  %v89_v7 = vmax.f32 %v81_v62, 0.0  ;;  %v53_v18 = vadd.f32 %v45_v0, %v32_v59  ;;  %v1617_v62 = vld [vmem:[%s2173_s2 + $0x188] sm:$0xff]  }
  0x15   :  { %1477 = vmatpush3.bf16.msra.mxu1 %v1597_v19  ;;  %1456 = vmatprep.subr.bf16.mxu0 %v1598_v20  ;;  %v93_v8 = vmax.f32 %v85_v63, 0.0  ;;  %v87_v19 = vadd.f32 %v1856_v6, %v58_v13  ;;  %v1883_v20 = vld [vmem:[%s2174_s0 + $0x98] sm:$0xff]  ;;  %v91_v24 = vmax.f32 %v83_v16, 0.0 }
  0x16   :  { %1478 = vmatprep.subr.bf16.mxu1 %v1599_v21  ;;  %v57_v21 = vadd.f32 %v49_v4, %v36_v3  ;;  %v448_v43 = vunpack.c.h.bf16 %v1883_v20  ;;  %v1623_v13 = vld [vmem:[%s2173_s2 + $0x1d8] sm:$0xff]  }
  0x17   :  { %v97_v15 = vpack.c.bf16 %v93_v8, %v89_v7  ;;  %v95_v29 = vmax.f32 %v87_v19, 0.0  ;;  %v1621_v8 = vld [vmem:[%s2173_s2 + $0x190] sm:$0xff]   ;;  %v1625_v16 = vld [vmem:[%s2173_s2 + $0x198] sm:$0xff]   ;;  %v445_v19 = vunpack.c.l.bf16 %v1861_v9 }
  0x18   :  { %1457 = vmatpush3.bf16.msra.mxu0 %v1600_v22  ;;  %v1887_v22 = vrot.slane %v25_v35, %v70_v51  ;;  %v456_v56 = vadd.f32 %v448_v43, %v33_v55 }
  0x19   :  { %1479 = vmatpush3.bf16.msra.mxu1 %v1601_v23  ;;  %1458 = vmatprep.subr.bf16.mxu0 %v1602_v25  ;;  %v446_v23 = vunpack.c.h.bf16 %v1861_v9  ;;  %v1893_v25 = vld [vmem:[%s2174_s0 + $0xb8] sm:$0xff]  ;;  %v99_v46 = vpack.c.bf16 %v95_v29, %v91_v24  ;;  %v449_v24 = vunpack.c.l.bf16 %v1866_v10  ;;  %v1629_v29 = vld [vmem:[%s2173_s2 + $0x1a0] sm:$0xff]  }
  0x1a   :  { %1480 = vmatprep.subr.bf16.mxu1 %v1603_v26  ;;  %388 = vmatprep.mubr.bf16.mxu0 %v97_v15  ;;  %v80_v26 = vadd.f32 %v1875_v17, %v51_v12  ;;  %v452_v54 = vunpack.c.h.bf16 %v1893_v25  ;;  %v464_v55 = vadd.f32 %v456_v56, %v1856_v6  ;;  %v1622_v12 = vld [vmem:[%s2173_s2 + $0x158] sm:$0xff]  }
  0x1b   :  { %429 = vmatprep.mubr.bf16.mxu1 %v99_v46  ;;  %v1624_v15 = vld [vmem:[%s2173_s2 + $0x118] sm:$0xff]  }
  0x1c   :  { %1459 = vmatpush3.bf16.msra.mxu0 %v1604_v27  ;;  %v84_v27 = vadd.f32 %v1875_v17, %v55_v14  ;;  %v88_v34 = vmax.f32 %v80_v26, 0.0  ;;  %v460_v0 = vadd.f32 %v452_v54, %v37_v60  ;;  %v472_v7 = vmax.f32 %v464_v55, 0.0  ;;  %v1620_v60 = vld [vmem:[%s2173_s2 + $0x110] sm:$0xff]   ;;  %v1628_v26 = vld [vmem:[%s2173_s2 + $0x120] sm:$0xff]   ;;  %v1646_v55 = vld [vmem:[%s2173_s2 + $0x248] sm:$0xff]  }
  0x1d   :  { %1481 = vmatpush3.bf16.msra.mxu1 %v1605_v28  ;;  %1460 = vmatprep.subr.bf16.mxu0 %v1606_v30  ;;  %v450_v28 = vunpack.c.h.bf16 %v1866_v10  ;;  %v82_v30 = vadd.f32 %v1887_v22, %v53_v18  ;;  %v1626_v18 = vld [vmem:[%s2173_s2 + $0x160] sm:$0xff]  }
  0x1e   :  { %1482 = vmatprep.subr.bf16.mxu1 %v1607_v31  ;;  %v86_v31 = vadd.f32 %v1887_v22, %v57_v21  ;;  %v92_v35 = vmax.f32 %v84_v27, 0.0  ;;  %v468_v5 = vadd.f32 %v460_v0, %v1856_v6  ;;  %v1627_v21 = vld [vmem:[%s2173_s2 + $0x1e0] sm:$0xff]   ;;  %v447_v27 = vunpack.c.l.bf16 %v1883_v20 }
  0x1f   :  { %v458_v42 = vadd.f32 %v450_v28, %v35_v39  ;;  %v90_v49 = vmax.f32 %v82_v30, 0.0  ;;  %v451_v30 = vunpack.c.l.bf16 %v1893_v25 }
  0x20   :  { %1461 = vmatpush3.bf16.msra.mxu0 %v1608_v32  ;;  %v1612_v32 = vld [vmem:[%s2173_s2 + $0x100] sm:$0xff]   ;;  %v96_v51 = vpack.c.bf16 %v92_v35, %v88_v34  ;;  %v476_v11 = vmax.f32 %v468_v5, 0.0  ;;  %v457_v34 = vadd.f32 %v449_v24, %v34_v57  ;;  %v1632_v35 = vld [vmem:[%s2173_s2 + $0x128] sm:$0xff]   ;;  %v455_v36 = vadd.f32 %v447_v27, %v32_v59  ;;  %v1634_v57 = vld [vmem:[%s2173_s2 + $0x170] sm:$0xff]  }
  0x21   :  { %1483 = vmatpush3.bf16.msra.mxu1 %v1609_v33  ;;  %1490 = vmatprep.subr.bf16.mxu0 %v1610_v61  ;;  %v454_v33 = vadd.f32 %v446_v23, %v31_v38  ;;  %v94_v38 = vmax.f32 %v86_v31, 0.0  ;;  %v466_v53 = vadd.f32 %v458_v42, %v1831_v48  ;;  %v1630_v31 = vld [vmem:[%s2173_s2 + $0x168] sm:$0xff]   ;;  %v459_v37 = vadd.f32 %v451_v30, %v36_v3  ;;  %v1638_v42 = vld [vmem:[%s2173_s2 + $0x178] sm:$0xff]   ;;  %v1650_v5 = vld [vmem:[%s2173_s2 + $0x250] sm:$0xff]  }
  0x22   :  { %1512 = vmatprep.subr.bf16.mxu1 %v1611_v2  ;;  %v1619_v2 = vld [vmem:[%s2173_s2 + $0x1d0] sm:$0xff]   ;;  %v480_v14 = vpack.c.bf16 %v476_v11, %v472_v7  ;;  %v465_v3 = vadd.f32 %v457_v34, %v1875_v17  ;;  %v1654_v11 = vld [vmem:[%s2173_s2 + $0x258] sm:$0xff]  }
  0x23   :  { %v462_v50 = vadd.f32 %v454_v33, %v1831_v48  ;;  %v98_v39 = vpack.c.bf16 %v94_v38, %v90_v49  ;;  %389 = vmatmul.mubr.bf16.vlgmr.msra.gmra.mrb[0].mxu0 %v96_v51  ;;  %v474_v63 = vmax.f32 %v466_v53, 0.0  ;;  %v1631_v33 = vld [vmem:[%s2173_s2 + $0x1e8] sm:$0xff]   ;;  %v467_v46 = vadd.f32 %v459_v37, %v1887_v22  ;;  %v1639_v49 = vld [vmem:[%s2173_s2 + $0x1f8] sm:$0xff]   ;;  %v1651_v7 = vld [vmem:[%s2173_s2 + $0x2d0] sm:$0xff]  }
  0x24   :  { %1491 = vmatpush3.bf16.msra.mxu0 %v1612_v32  ;;  %v453_v32 = vadd.f32 %v445_v19, %v30_v47  ;;  %v1633_v47 = vld [vmem:[%s2173_s2 + $0x1a8] sm:$0xff]   ;;  %v473_v51 = vmax.f32 %v465_v3, 0.0  ;;  %v1667_v34 = vld [vmem:[%s2173_s2 + $0x2f0] sm:$0xff]  }
  0x25   :  { %v470_v61 = vmax.f32 %v462_v50, 0.0  ;;  %430 = vmatmul.mubr.bf16.vlgmr.msra.gmra.mrb[0].mxu1 %v98_v39  ;;  %1492 = vmatprep.subr.bf16.mxu0 %v1614_v41  ;;  %v463_v41 = vadd.f32 %v455_v36, %v1887_v22  ;;  %v1640_v50 = vld [vmem:[%s2173_s2 + $0x138] sm:$0xff]   ;;  %v475_v56 = vmax.f32 %v467_v46, 0.0  ;;  %v1642_v39 = vld [vmem:[%s2173_s2 + $0x240] sm:$0xff]  }
  0x26   :  { %1513 = vmatpush3.bf16.msra.mxu1 %v1613_v40  ;;  %811 = vmatprep.mubr.bf16.mxu1 %v480_v14  ;;  %v461_v59 = vadd.f32 %v453_v32, %v1875_v17  ;;  %v1637_v40 = vld [vmem:[%s2173_s2 + $0x1b0] sm:$0xff]   ;;  %v1657_v14 = vld [vmem:[%s2173_s2 + $0x298] sm:$0xff]   ;;  %v1665_v32 = vld [vmem:[%s2173_s2 + $0x2a8] sm:$0xff]  }
  0x27   :  { %v478_v4 = vpack.c.bf16 %v474_v63, %v470_v61  ;;  %1514 = vmatprep.subr.bf16.mxu1 %v1615_v52  ;;  %v1641_v52 = vld [vmem:[%s2173_s2 + $0x1b8] sm:$0xff]   ;;  %v471_v53 = vmax.f32 %v463_v41, 0.0  ;;  %v1644_v61 = vld [vmem:[%s2173_s2 + $0x200] sm:$0xff]   ;;  %v1668_v41 = vld [vmem:[%s2173_s2 + $0x230] sm:$0xff]  }
  0x28   :  { %1493 = vmatpush3.bf16.msra.mxu0 %v1616_v58  ;;  %v469_v38 = vmax.f32 %v461_v59, 0.0  ;;  %v1643_v58 = vld [vmem:[%s2173_s2 + $0x2c0] sm:$0xff]  }
  0x29   :  { %770 = vmatprep.mubr.bf16.mxu0 %v478_v4  ;;  %1494 = vmatprep.subr.bf16.mxu0 %v1618_v1  ;;  %v1645_v63 = vld [vmem:[%s2173_s2 + $0x280] sm:$0xff]   ;;  %v479_v0 = vpack.c.bf16 %v475_v56, %v471_v53  ;;  %v1647_v1 = vld [vmem:[%s2173_s2 + $0x2c8] sm:$0xff]  }
  0x2a   :  { %1515 = vmatpush3.bf16.msra.mxu1 %v1617_v62  ;;  %v477_v62 = vpack.c.bf16 %v473_v51, %v469_v38  ;;  %v1649_v4 = vld [vmem:[%s2173_s2 + $0x288] sm:$0xff]   ;;  %v1348_v36 = vld [vmem:[%s2174_s0 + $0x60] sm:$0xff]  ;;  %v1670_v51 = vld [vmem:[%s2173_s2 + $0x278] sm:$0xff]  }
  0x2b   :  { %1516 = vmatprep.subr.bf16.mxu1 %v1619_v2  ;;  %v1648_v2 = vld [vmem:[%s2173_s2 + $0x208] sm:$0xff]   ;;  %v830_v59 = vunpack.c.l.bf16 %v1348_v36 }
  0x2c   :  { %1495 = vmatpush3.bf16.msra.mxu0 %v1620_v60  ;;  %v1652_v60 = vld [vmem:[%s2173_s2 + $0x210] sm:$0xff]  }
  0x2d   :  { %1496 = vmatprep.subr.bf16.mxu0 %v1622_v12  ;;  %v1655_v12 = vld [vmem:[%s2173_s2 + $0x2d8] sm:$0xff]   ;;  %v838_v9 = vadd.f32 %v830_v59, %v449_v24 }
  0x2e   :  { %1517 = vmatpush3.bf16.msra.mxu1 %v1621_v8  ;;  %v1653_v8 = vld [vmem:[%s2173_s2 + $0x290] sm:$0xff]  }
  0x2f   :  { %1518 = vmatprep.subr.bf16.mxu1 %v1623_v13  ;;  %v1656_v13 = vld [vmem:[%s2173_s2 + $0x218] sm:$0xff]   ;;  %v846_v24 = vadd.f32 %v838_v9, %v1875_v17 }
  0x30   :  { %1497 = vmatpush3.bf16.msra.mxu0 %v1624_v15  ;;  %v1658_v15 = vld [vmem:[%s2173_s2 + $0x260] sm:$0xff]  }
  0x31   :  { %1498 = vmatprep.subr.bf16.mxu0 %v1626_v18  ;;  %v1660_v18 = vld [vmem:[%s2173_s2 + $0x220] sm:$0xff]  }
  0x32   :  { %1519 = vmatpush3.bf16.msra.mxu1 %v1625_v16  ;;  %v1659_v16 = vld [vmem:[%s2173_s2 + $0x2e0] sm:$0xff]  }
  0x33   :  { %1520 = vmatprep.subr.bf16.mxu1 %v1627_v21  ;;  %v1661_v21 = vld [vmem:[%s2173_s2 + $0x2a0] sm:$0xff]  }
  0x34   :  { %1499 = vmatpush3.bf16.msra.mxu0 %v1628_v26  ;;  %v1662_v26 = vld [vmem:[%s2173_s2 + $0x268] sm:$0xff]  }
  0x35   :  { %1500 = vmatprep.subr.bf16.mxu0 %v1630_v31  ;;  %v1664_v31 = vld [vmem:[%s2173_s2 + $0x228] sm:$0xff]  }
  0x36   :  { %1521 = vmatpush3.bf16.msra.mxu1 %v1629_v29  ;;  %v1663_v29 = vld [vmem:[%s2173_s2 + $0x2e8] sm:$0xff]  }
  0x37   :  { %1522 = vmatprep.subr.bf16.mxu1 %v1631_v33  ;;  %v1666_v33 = vld [vmem:[%s2173_s2 + $0x270] sm:$0xff]  }
  0x38   :  { %1501 = vmatpush3.bf16.msra.mxu0 %v1632_v35  ;;  %v1346_v35 = vld [vmem:[%s2174_s0 + $0x40] sm:$0xff] }
  0x39   :  { %1502 = vmatprep.subr.bf16.mxu0 %v1634_v57  ;;  %v827_v37 = vunpack.c.h.bf16 %v1346_v35  ;;  %v1347_v57 = vld [vmem:[%s2174_s0 + $0x48] sm:$0xff] }
  0x3a   :  { %1523 = vmatpush3.bf16.msra.mxu1 %v1633_v47  ;;  %v826_v47 = vunpack.c.l.bf16 %v1346_v35  ;;  %v828_v3 = vunpack.c.l.bf16 %v1347_v57 }
  0x3b   :  { %1524 = vmatprep.subr.bf16.mxu1 %v1635_v44  ;;  %v1349_v44 = vld [vmem:[%s2174_s0 + $0x68] sm:$0xff] }
  0x3c   :  { %1503 = vmatpush3.bf16.msra.mxu0 %v1636_v45  ;;  %v831_v45 = vunpack.c.h.bf16 %v1348_v36  ;;  %v832_v46 = vunpack.c.l.bf16 %v1349_v44  ;;  %v834_v38 = vadd.f32 %v826_v47, %v445_v19  ;;  %v1671_v19 = vld [vmem:[%s2173_s2 + $0x2f8] sm:$0xff]  }
  0x3d   :  { %1504 = vmatprep.subr.bf16.mxu0 %v1638_v42  ;;  %v835_v42 = vadd.f32 %v827_v37, %v446_v23 }
  0x3e   :  { %1525 = vmatpush3.bf16.msra.mxu1 %v1637_v40  ;;  %v829_v40 = vunpack.c.h.bf16 %v1347_v57 }
  0x3f   :  { %1526 = vmatprep.subr.bf16.mxu1 %v1639_v49  ;;  %v833_v49 = vunpack.c.h.bf16 %v1349_v44  ;;  %v843_v53 = vadd.f32 %v835_v42, %v1831_v48 }
  0x40   :  { %1505 = vmatpush3.bf16.msra.mxu0 %v1640_v50  ;;  %v1669_v50 = vld [vmem:[%s2173_s2 + $0x2b0] sm:$0xff]   ;;  %v837_v23 = vadd.f32 %v829_v40, %v448_v43 }
  0x41   :  { %1534 = vmatprep.subr.bf16.mxu0 %v1642_v39  ;;  %v841_v56 = vadd.f32 %v833_v49, %v452_v54  ;;  %v842_v39 = vadd.f32 %v834_v38, %v1875_v17  ;;  %v851_v54 = vmax.f32 %v843_v53, 0.0 }
  0x42   :  { %1527 = vmatpush3.bf16.msra.mxu1 %v1641_v52  ;;  %v839_v52 = vadd.f32 %v831_v45, %v450_v28  ;;  %v836_v28 = vadd.f32 %v828_v3, %v447_v27  ;;  %v845_v10 = vadd.f32 %v837_v23, %v1856_v6  ;;  %v854_v27 = vmax.f32 %v846_v24, 0.0 }
  0x43   :  { %1556 = vmatprep.subr.bf16.mxu1 %v1643_v58  ;;  %771 = vmatmul.mubr.bf16.vlgmr.msra.gmra.mrb[4].mxu0 %v477_v62  ;;  %v840_v58 = vadd.f32 %v832_v46, %v451_v30  ;;  %v849_v62 = vadd.f32 %v841_v56, %v1856_v6 }
  0x44   :  { %1535 = vmatpush3.bf16.msra.mxu0 %v1644_v61  ;;  %v847_v43 = vadd.f32 %v839_v52, %v1831_v48  ;;  %v1672_v61 = vld [vmem:[%s2173_s2 + $0x238] sm:$0xff]   ;;  %v844_v20 = vadd.f32 %v836_v28, %v1887_v22  ;;  %v853_v25 = vmax.f32 %v845_v10, 0.0 }
  0x45   :  { %812 = vmatmul.mubr.bf16.vlgmr.msra.gmra.mrb[4].mxu1 %v479_v0  ;;  %1536 = vmatprep.subr.bf16.mxu0 %v1646_v55  ;;  %v1673_v48 = vld [vmem:[%s2173_s2 + $0x2b8] sm:$0xff]   ;;  %v848_v30 = vadd.f32 %v840_v58, %v1887_v22  ;;  %v857_v0 = vmax.f32 %v849_v62, 0.0 }
  0x46   :  { %1557 = vmatpush3.bf16.msra.mxu1 %v1645_v63  ;;  %v850_v63 = vmax.f32 %v842_v39, 0.0  ;;  %v855_v17 = vmax.f32 %v847_v43, 0.0  ;;  %v852_v55 = vmax.f32 %v844_v20, 0.0 }
  0x47   :  { %1558 = vmatprep.subr.bf16.mxu1 %v1647_v1  ;;  %v856_v6 = vmax.f32 %v848_v30, 0.0 }
  0x48   :  { %1537 = vmatpush3.bf16.msra.mxu0 %v1648_v2  ;;  %v859_v1 = vpack.c.bf16 %v855_v17, %v851_v54  ;;  %v858_v2 = vpack.c.bf16 %v854_v27, %v850_v63 }
  0x49   :  { %1538 = vmatprep.subr.bf16.mxu0 %v1650_v5  ;;  %v860_v5 = vpack.c.bf16 %v856_v6, %v852_v55 }
  0x4a   :  { %1559 = vmatpush3.bf16.msra.mxu1 %v1649_v4  ;;  %v861_v4 = vpack.c.bf16 %v857_v0, %v853_v25  ;;  %1151 = vmatprep.mubr.bf16.mxu0 %v859_v1 }
  0x4b   :  { %1560 = vmatprep.subr.bf16.mxu1 %v1651_v7 }
  0x4c   :  { %1539 = vmatpush3.bf16.msra.mxu0 %v1652_v60  ;;  %1192 = vmatprep.mubr.bf16.mxu1 %v861_v4 }
  0x4d   :  { %1540 = vmatprep.subr.bf16.mxu0 %v1654_v11 }
  0x4e   :  { %1561 = vmatpush3.bf16.msra.mxu1 %v1653_v8 }
  0x4f   :  { %1562 = vmatprep.subr.bf16.mxu1 %v1655_v12 }
  0x50   :  { %1541 = vmatpush3.bf16.msra.mxu0 %v1656_v13 }
  0x51   :  { %1542 = vmatprep.subr.bf16.mxu0 %v1658_v15 }
  0x52   :  { %1563 = vmatpush3.bf16.msra.mxu1 %v1657_v14 }
  0x53   :  { %1564 = vmatprep.subr.bf16.mxu1 %v1659_v16 }
  0x54   :  { %1543 = vmatpush3.bf16.msra.mxu0 %v1660_v18 }
  0x55   :  { %1544 = vmatprep.subr.bf16.mxu0 %v1662_v26 }
  0x56   :  { %1565 = vmatpush3.bf16.msra.mxu1 %v1661_v21 }
  0x57   :  { %1566 = vmatprep.subr.bf16.mxu1 %v1663_v29 }
  0x58   :  { %1545 = vmatpush3.bf16.msra.mxu0 %v1664_v31 }
  0x59   :  { %1546 = vmatprep.subr.bf16.mxu0 %v1666_v33 }
  0x5a   :  { %1567 = vmatpush3.bf16.msra.mxu1 %v1665_v32 }
  0x5b   :  { %1568 = vmatprep.subr.bf16.mxu1 %v1667_v34  ;;  %v1209_v34 = vld [vmem:[%s2176_s3] ss:$0 sm:$0xff] }
  0x5c   :  { %1547 = vmatpush3.bf16.msra.mxu0 %v1668_v41 }
  0x5d   :  { %1548 = vmatprep.subr.bf16.mxu0 %v1670_v51 }
  0x5e   :  { %1569 = vmatpush3.bf16.msra.mxu1 %v1669_v50 }
  0x5f   :  { %1570 = vmatprep.subr.bf16.mxu1 %v1671_v19 }
  0x60   :  { %1549 = vmatpush3.bf16.msra.mxu0 %v1672_v61 }
  0x62   :  { %1571 = vmatpush3.bf16.msra.mxu1 %v1673_v48 }
  0x63   :  { %1152 = vmatmul.mubr.bf16.vlgmr.msra.gmra.mrb[8].mxu0 %v858_v2 }
  0x65   :  { %1193 = vmatmul.mubr.bf16.vlgmr.msra.gmra.mrb[8].mxu1 %v860_v5 }
  0xf6   :  { %v1462_v7 = vpop.f32.mrb[0].mxu0 }
  0xf7   :  { %v1463_v8 = vpop.f32.mrb[1].mxu0 }
  0xf8   :  { %v1484_v60 = vpop.f32.mrb[0].mxu1  ;;  %v1464_v11 = vadd.f32 %v1463_v8, %v1462_v7  ;;  %v1465_v22 = vpop.f32.mrb[2].mxu0 }
  0xf9   :  { %v1485_v12 = vpop.f32.mrb[1].mxu1  ;;  %v1466_v15 = vpop.f32.mrb[3].mxu0 }
  0xfa   :  { %v1486_v13 = vadd.f32 %v1485_v12, %v1484_v60  ;;  %v1487_v14 = vpop.f32.mrb[2].mxu1  ;;  %v1467_v16 = vadd.f32 %v1466_v15, %v1465_v22 }
  0xfb   :  { %v1488_v18 = vpop.f32.mrb[3].mxu1 }
  0xfc   :  { %v432_v21 = vadd.f32 %v1486_v13, %v1464_v11  ;;  %v1489_v26 = vadd.f32 %v1488_v18, %v1487_v14 }
  0xfe   :  { %v435_v29 = vadd.f32 %v1489_v26, %v1467_v16  ;;  %v438_v3 = vadd.f32 %v1209_v34, %v432_v21 }
 0x100   :  { %v439_v42 = vadd.f32 %v1209_v34, %v435_v29 }
 0x116   :  { %v1506_v31 = vpop.f32.mrb[4].mxu0 }
 0x117   :  { %v1507_v33 = vpop.f32.mrb[5].mxu0 }
 0x118   :  { %v1528_v32 = vpop.f32.mrb[4].mxu1  ;;  %v1508_v35 = vadd.f32 %v1507_v33, %v1506_v31  ;;  %v1509_v47 = vpop.f32.mrb[6].mxu0 }
 0x119   :  { %v1529_v36 = vpop.f32.mrb[5].mxu1  ;;  %v1510_v44 = vpop.f32.mrb[7].mxu0 }
 0x11a   :  { %v1530_v37 = vadd.f32 %v1529_v36, %v1528_v32  ;;  %v1531_v57 = vpop.f32.mrb[6].mxu1  ;;  %v1511_v59 = vadd.f32 %v1510_v44, %v1509_v47 }
 0x11b   :  { %v1532_v45 = vpop.f32.mrb[7].mxu1 }
 0x11c   :  { %v814_v40 = vadd.f32 %v1530_v37, %v1508_v35  ;;  %v1533_v41 = vadd.f32 %v1532_v45, %v1531_v57 }
 0x11e   :  { %v820_v46 = vadd.f32 %v814_v40, %v438_v3  ;;  %v817_v49 = vadd.f32 %v1533_v41, %v1511_v59 }
 0x120   :  { %v821_v38 = vadd.f32 %v817_v49, %v439_v42 }
 0x136   :  { %v1550_v50 = vpop.f32.mrb[8].mxu0 }
 0x137   :  { %v1551_v52 = vpop.f32.mrb[9].mxu0 }
 0x138   :  { %v1572_v51 = vpop.f32.mrb[8].mxu1  ;;  %v1552_v23 = vadd.f32 %v1551_v52, %v1550_v50  ;;  %v1553_v19 = vpop.f32.mrb[10].mxu0 }
 0x139   :  { %v1573_v9 = vpop.f32.mrb[9].mxu1  ;;  %v1554_v39 = vpop.f32.mrb[11].mxu0 }
 0x13a   :  { %v1574_v53 = vadd.f32 %v1573_v9, %v1572_v51  ;;  %v1575_v56 = vpop.f32.mrb[10].mxu1  ;;  %v1555_v28 = vadd.f32 %v1554_v39, %v1553_v19 }
 0x13b   :  { %v1576_v43 = vpop.f32.mrb[11].mxu1 }
 0x13c   :  { %v1195_v10 = vadd.f32 %v1574_v53, %v1552_v23  ;;  %v1577_v24 = vadd.f32 %v1576_v43, %v1575_v56 }
 0x13e   :  { %v1201_v58 = vadd.f32 %v1195_v10, %v820_v46  ;;  %v1198_v61 = vadd.f32 %v1577_v24, %v1555_v28 }
 0x140   :  { %1203 = vst [vmem:[%s2177_s4] sm:$0xff] %v1201_v58  ;;  %v1202_v54 = vadd.f32 %v1198_v61, %v821_v38 }
 0x142   :  { %1204 = vst [vmem:[%s2177_s4 + $0x8] sm:$0xff] %v1202_v54 }

</bundles_post_ra>
